<compile_context>
chip_gen: v6e
topology: v6e:2x2x1
jax: 0.10.0
libtpu: 0.0.40
codegen_flags: <defaults>
</compile_context>

<pallas_src>
import functools
import math

import jax
import jax.numpy as jnp
from jax.experimental import pallas as pl
from jax.experimental.pallas import tpu as pltpu

_SQRT2 = math.sqrt(2.0)
_GELU_C0 = 0.7978845608028654        # sqrt(2/pi)
_GELU_C1 = 0.044715
_BN_EPS = 1e-5
# MXU operand precision (accumulation stays f32 via preferred_element_type).
MATMUL_DTYPE = jnp.bfloat16


# ---------------------------------------------------------------------------
# in-kernel math helpers
# ---------------------------------------------------------------------------
def _swap_halves(x, half):
    """[a | b] -> [b | a] along the packed (lane) axis.  Static lane slices +
    concat: the standard RoPE-style half-rotation, cheap XLU/relayout work."""
    return jnp.concatenate([x[..., half:], x[..., :half]], axis=-1)


def _gelu_tanh(x):
    """tanh-form GELU (|gelu_tanh - gelu_erf| <= ~5e-4): one EUP push + ~7 VALU
    ops.  Computed in f32; output is cast to bf16 only as the MXU operand.
    NOTE: on v6e/v7x this could run in bf16 for 2x VALU throughput; kept f32 to
    track torch's erf-GELU reference tightly and stay v5e-friendly."""
    return 0.5 * x * (1.0 + jnp.tanh(_GELU_C0 * x * (1.0 + _GELU_C1 * x * x)))


def _complex_bn_packed(x, half, wd, wo, bb, eps=_BN_EPS):
    """ComplexBatchNorm1d (track_running_stats=False -> batch statistics) on
    lane-packed [real | imag] activations.

    x: (B, Lt, 2D) packed; wd = [w_rr|w_ii], wo = [w_ri|w_ri], bb = [b_r|b_i],
    each (1, 2D).  Statistics are per-(l, d) over the batch axis only, so
    tiling over L is exact.
    """
    m = jnp.mean(x, axis=0, keepdims=True)
    c = x - m                                  # centered, packed [cr | ci]
    cs = _swap_halves(c, half)                 # [ci | cr]
    v = jnp.mean(c * c, axis=0) + eps          # [Crr | Cii]  (biased var + eps)
    cri = jnp.mean(c * cs, axis=0)             # [Cri | Cri]
    vs = _swap_halves(v, half)                 # [Cii | Crr]
    det = v * vs - cri * cri                   # [det | det]
    s = jnp.sqrt(det)
    # 1/(sqrt(det)*sqrt(Crr+Cii+2s)) as a product of two rsqrt's (EUP slot);
    # avoids forming det*(Crr+Cii+2s), i.e. overflow-safer than the fused form.
    inv_st = jax.lax.rsqrt(det) * jax.lax.rsqrt(v + vs + 2.0 * s)
    rdiag = (vs + s) * inv_st                  # [Rrr | Rii]
    roff = -cri * inv_st                       # [Rri | Rri]
    y = rdiag * c + roff * cs                  # whitened, packed
    ys = _swap_halves(y, half)
    return wd * y + wo * ys + bb               # affine, packed


# ---------------------------------------------------------------------------
# kernel
# ---------------------------------------------------------------------------
def _tst_encoder_kernel(x_ref, cwa_ref, cwb_ref, wd_ref, wo_ref, bb_ref,
                        w1_ref, b1_ref, w2_ref, b2_ref, o_ref):
    B, Lt, D2 = x_ref.shape
    half = D2 // 2

    x = x_ref[...]                             # packed [re | im], (B, Lt, 2D)

    # src = src * (1 + complex_weight)   (residual folded into the weight):
    #   real: xr*(1+wr) - xi*wi ; imag: xi*(1+wr) + xr*wi
    t = x * cwa_ref[...] + _swap_halves(x, half) * cwb_ref[...]

    wd, wo, bb = wd_ref[...], wo_ref[...], bb_ref[...]
    z1 = _complex_bn_packed(t, half, wd, wo, bb)              # post-norm #1

    # ---- complex feed-forward: ONE fused bf16 MXU matmul per complex Linear,
    # applied directly to the lane-packed activations (no pack/unpack scratch).
    x2d = z1.reshape(B * Lt, D2).astype(MATMUL_DTYPE)
    h = jnp.dot(x2d, w1_ref[...], preferred_element_type=jnp.float32) + b1_ref[...]
    a = _gelu_tanh(h).astype(MATMUL_DTYPE)                    # gelu on both halves
    g = jnp.dot(a, w2_ref[...], preferred_element_type=jnp.float32) + b2_ref[...]

    # residual + post-norm #2; single lane-dense store of the packed output.
    z2 = _complex_bn_packed(z1 + g.reshape(B, Lt, D2), half, wd, wo, bb)
    o_ref[...] = z2
    # NOTE: if 2*D is still < 128, folding consecutive L rows into lanes for
    # the elementwise/BN path would make it fully dense; skipped (matmul needs
    # the 2D-contraction layout and the benefit is profile-dependent).


# ---------------------------------------------------------------------------
# tiling / VMEM planning (generation-aware)
# ---------------------------------------------------------------------------
def _round_up(x, m):
    return ((x + m - 1) // m) * m


def _vmem_capacity_bytes():
    try:
        cap = getattr(pltpu.get_tpu_info(), "vmem_capacity_bytes", None)
        if cap:
            return int(cap)
    except Exception:
        pass
    return 64 * 1024 * 1024          # conservative (v7x-sized) fallback


def _plan_tiles(B, L, D2, F2, single_buffer_weights):
    """Pick the L tile from the actual VMEM budget: largest multiple of 8 whose
    per-step footprint fits ~65% of this chip's VMEM, capped so the 1-D grid
    keeps >= 2 steps (v7x megacore) whenever the sequence allows it."""
    vmem_cap = _vmem_capacity_bytes()
    budget = int(0.65 * vmem_cap)
    wbuf = 1 if single_buffer_weights else 2
    weights = wbuf * (2 * D2 * F2 * 2 + (F2 + 4 * D2) * 4)   # bf16 W1/W2 + f32 rest

    def footprint(lt):
        act = B * lt * D2 * 4        # one packed f32 activation tile
        cw = lt * D2 * 4             # one complex-weight tile (2 such arrays)
        hid = B * lt * F2 * 4        # one f32 hidden temporary
        # in + out double-buffered, 2 cw streams double-buffered, ~6 activation
        # temporaries (BN/elementwise) and ~3 hidden temporaries (matmul/GELU).
        return 4 * act + 4 * cw + 6 * act + 3 * hid + weights

    cap_rows = min(_round_up(max(L, 8), 8), 1024)
    lt = 8
    for cand in range(8, cap_rows + 1, 8):
        if footprint(cand) <= budget:
            lt = cand
        else:
            break
    if L > 8:                        # keep >= 2 grid steps for 2-TensorCore parts
        lt = min(lt, _round_up(pl.cdiv(L, 2), 8))
    # MXU M-fill: prefer B*lt >= 256 when it fits and still leaves >= 2 steps.
    want = min(_round_up(max(8, pl.cdiv(256, B)), 8), cap_rows)
    if (want > lt and footprint(want) <= budget
            and (L <= 8 or want <= _round_up(pl.cdiv(L, 2), 8))):
        lt = want
    n_steps = pl.cdiv(L, lt)
    vmem_limit = int(min(0.9 * vmem_cap, 128 * 1024 * 1024))
    return lt, n_steps, vmem_limit


# ---------------------------------------------------------------------------
# wrapper
# ---------------------------------------------------------------------------
@functools.partial(jax.jit, static_argnames=("single_buffer_weights",))
def _encoder_impl(src_r, src_i, fused, *, single_buffer_weights=True):
    B, L, D = src_r.shape
    D2 = 2 * D
    F2 = fused["w1c"].shape[1]                 # 2 * d_ff
    lt, n_steps, vmem_limit = _plan_tiles(B, L, D2, F2, single_buffer_weights)
    Lp = n_steps * lt

    x = jnp.concatenate([src_r, src_i], axis=-1)   # lane-packed [re | im]
    cw_a, cw_b = fused["cw_a"], fused["cw_b"]
    if Lp != L:
        # zero-pad ragged L: exact, padded rows never mix with real rows
        # (BN stats and complex_weight are per-(l, d)); they are sliced off.
        x = jnp.pad(x, ((0, 0), (0, Lp - L), (0, 0)))
        cw_a = jnp.pad(cw_a, ((0, Lp - L), (0, 0)))
        cw_b = jnp.pad(cw_b, ((0, Lp - L), (0, 0)))

    act_spec = pl.BlockSpec((B, lt, D2), lambda i: (0, i, 0))
    cw_spec = pl.BlockSpec((lt, D2), lambda i: (i, 0))

    def const_spec(shape):
        if single_buffer_weights:
            # grid-invariant operands: do not double-buffer the resident
            # weights / BN params in VMEM (matters most on 64 MiB v7x parts).
            return pl.BlockSpec(shape, lambda i: (0, 0),
                                pipeline_mode=pl.Buffered(1))
        return pl.BlockSpec(shape, lambda i: (0, 0))

    out = pl.pallas_call(
        _tst_encoder_kernel,
        out_shape=jax.ShapeDtypeStruct((B, Lp, D2), jnp.float32),
        grid=(n_steps,),
        in_specs=[
            act_spec,                                            # packed src
            cw_spec, cw_spec,                                    # complex weight
            const_spec((1, D2)), const_spec((1, D2)), const_spec((1, D2)),  # BN
            const_spec((D2, F2)), const_spec((1, F2)),           # fused W1, b1
            const_spec((F2, D2)), const_spec((1, D2)),           # fused W2, b2
        ],
        out_specs=act_spec,
        compiler_params=pltpu.CompilerParams(
            dimension_semantics=("parallel",),
            vmem_limit_bytes=vmem_limit),
    )(x, cw_a, cw_b,
      fused["bn_wd"], fused["bn_wo"], fused["bn_bb"],
      fused["w1c"], fused["b1c"], fused["w2c"], fused["b2c"])

    out = out[:, :L, :]
    return out[..., :D], out[..., D:]


_single_buffer_ok = True


def tst_encoder_layer(src_r, src_i, fused):
    """src_r / src_i: (B, L, D) real / imaginary parts of the complex input."""
    global _single_buffer_ok
    if _single_buffer_ok:
        try:
            return _encoder_impl(src_r, src_i, fused, single_buffer_weights=True)
        except Exception:
            # pl.Buffered(1) unsupported by this jax/Mosaic build -> fall back
            # to default double-buffering of the grid-invariant operands.
            _single_buffer_ok = False
    return _encoder_impl(src_r, src_i, fused, single_buffer_weights=False)


def prepare_params(p):
    """One-time preprocessing into the kernel's lane-packed [real | imag] layout:
      * fused block weights  W_c = [[w, wf], [-wf, w]]  as bf16 MXU operands,
      * bias pairs (b - b_fu, b + b_fu),
      * residual folded into the complex weight (src*w + src == src*(1+w)),
      * BN affine rows packed as [w_rr|w_ii], [w_ri|w_ri], [b_r|b_i]."""
    w1c = jnp.concatenate(
        [jnp.concatenate([p["w1"], p["w1_fu"]], axis=1),
         jnp.concatenate([-p["w1_fu"], p["w1"]], axis=1)], axis=0)
    w2c = jnp.concatenate(
        [jnp.concatenate([p["w2"], p["w2_fu"]], axis=1),
         jnp.concatenate([-p["w2_fu"], p["w2"]], axis=1)], axis=0)
    cw1 = 1.0 + p["cw_r"]
    return dict(
        cw_a=jnp.concatenate([cw1, cw1], axis=-1),
        cw_b=jnp.concatenate([-p["cw_i"], p["cw_i"]], axis=-1),
        bn_wd=jnp.concatenate([p["bn_w"][0:1, :], p["bn_w"][1:2, :]], axis=-1),
        bn_wo=jnp.concatenate([p["bn_w"][2:3, :], p["bn_w"][2:3, :]], axis=-1),
        bn_bb=jnp.concatenate([p["bn_b"][0:1, :], p["bn_b"][1:2, :]], axis=-1),
        w1c=w1c.astype(MATMUL_DTYPE),
        b1c=jnp.concatenate([p["b1"] - p["b1_fu"], p["b1"] + p["b1_fu"]], axis=-1),
        w2c=w2c.astype(MATMUL_DTYPE),
        b2c=jnp.concatenate([p["b2"] - p["b2_fu"], p["b2"] + p["b2_fu"]], axis=-1),
    )


# ---------------------------------------------------------------------------
# parameter init + pure-JAX reference (no Pallas)
# ---------------------------------------------------------------------------
def init_params(key, q_len, d_model, d_ff):
    ks = jax.random.split(key, 7)
    cw = jax.random.normal(ks[0], (q_len, d_model, 2), jnp.float32) * 0.02

    def linear(k, fan_in, fan_out):
        kw, kb = jax.random.split(k)
        bound = 1.0 / math.sqrt(fan_in)
        w = jax.random.uniform(kw, (fan_in, fan_out), jnp.float32, -bound, bound)
        b = jax.random.uniform(kb, (1, fan_out), jnp.float32, -bound, bound)
        return w, b

    w1, b1 = linear(ks[1], d_model, d_ff)
    w1f, b1f = linear(ks[2], d_model, d_ff)
    w2, b2 = linear(ks[3], d_ff, d_model)
    w2f, b2f = linear(ks[4], d_ff, d_model)

    # ComplexBatchNorm1d default affine init (w_rr=w_ii=sqrt(2), w_ri=0, b=0)
    # plus a small perturbation so the full affine path is exercised.
    bn_w = jnp.concatenate(
        [jnp.full((2, d_model), 1.4142135623730951, jnp.float32),
         jnp.zeros((1, d_model), jnp.float32)], axis=0)
    bn_w = bn_w + 0.1 * jax.random.normal(ks[5], (3, d_model), jnp.float32)
    bn_b = 0.1 * jax.random.normal(ks[6], (2, d_model), jnp.float32)

    return dict(cw_r=cw[..., 0], cw_i=cw[..., 1], bn_w=bn_w, bn_b=bn_b,
                w1=w1, b1=b1, w1_fu=w1f, b1_fu=b1f,
                w2=w2, b2=b2, w2_fu=w2f, b2_fu=b2f)


def _reference_bn(xr, xi, bn_w, bn_b, eps=_BN_EPS):
    """PyTorch-faithful ComplexBatchNorm1d (batch stats, var + divide form)."""
    mr = jnp.mean(xr, axis=0, keepdims=True)
    mi = jnp.mean(xi, axis=0, keepdims=True)
    cr, ci = xr - mr, xi - mi
    crr = jnp.var(xr, axis=0) + eps
    cii = jnp.var(xi, axis=0) + eps
    cri = jnp.mean(cr * ci, axis=0)
    det = crr * cii - cri * cri
    s = jnp.sqrt(det)
    t = jnp.sqrt(cii + crr + 2.0 * s)
    inv_st = 1.0 / (s * t)
    rrr = (cii + s) * inv_st
    rii = (crr + s) * inv_st
    rri = -cri * inv_st
    yr = rrr[None] * cr + rri[None] * ci
    yi = rii[None] * ci + rri[None] * cr
    zr = bn_w[0:1, :] * yr + bn_w[2:3, :] * yi + bn_b[0:1, :]
    zi = bn_w[2:3, :] * yr + bn_w[1:2, :] * yi + bn_b[1:2, :]
    return zr, zi


def reference(src_r, src_i, p):
    """Pure-JAX (non-Pallas) reference of the same forward pass.  Linear
    operands are cast to MATMUL_DTYPE to mirror the kernel's MXU input
    precision (accumulation is f32); everything else is exact f32 with the
    torch-default erf GELU."""
    wr, wi = p["cw_r"], p["cw_i"]
    s2r = src_r * wr - src_i * wi
    s2i = src_r * wi + src_i * wr
    xr, xi = s2r + src_r, s2i + src_i
    xr, xi = _reference_bn(xr, xi, p["bn_w"], p["bn_b"])

    def lin(x, w, b):
        return jnp.einsum("bld,df->blf",
                          x.astype(MATMUL_DTYPE), w.astype(MATMUL_DTYPE),
                          preferred_element_type=jnp.float32) + b

    fr = lin(xr, p["w1"], p["b1"]) - lin(xi, p["w1_fu"], p["b1_fu"])
    fi = lin(xi, p["w1"], p["b1"]) + lin(xr, p["w1_fu"], p["b1_fu"])
    gelu = lambda x: 0.5 * x * (1.0 + jax.scipy.special.erf(x / _SQRT2))
    fr, fi = gelu(fr), gelu(fi)
    gr = lin(fr, p["w2"], p["b2"]) - lin(fi, p["w2_fu"], p["b2_fu"])
    gi = lin(fi, p["w2"], p["b2"]) + lin(fr, p["w2_fu"], p["b2_fu"])
    xr, xi = xr + gr, xi + gi
    xr, xi = _reference_bn(xr, xi, p["bn_w"], p["bn_b"])
    return xr, xi


if __name__ == "__main__":
    B, Q_LEN, D_MODEL, D_FF = 4, 8, 32, 64
    key = jax.random.PRNGKey(0)
    k_r, k_i, k_p = jax.random.split(key, 3)
    src_r = jax.random.normal(k_r, (B, Q_LEN, D_MODEL), jnp.float32)
    src_i = jax.random.normal(k_i, (B, Q_LEN, D_MODEL), jnp.float32)
    params = init_params(k_p, Q_LEN, D_MODEL, D_FF)
    fused = prepare_params(params)

    out_r, out_i = tst_encoder_layer(src_r, src_i, fused)
    jax.block_until_ready((out_r, out_i))

    ref_r, ref_i = reference(src_r, src_i, params)
    assert out_r.shape == (B, Q_LEN, D_MODEL) and out_i.shape == (B, Q_LEN, D_MODEL)
    err_r = float(jnp.max(jnp.abs(out_r - ref_r)))
    err_i = float(jnp.max(jnp.abs(out_i - ref_i)))
    assert jnp.allclose(out_r, ref_r, atol=2e-2, rtol=2e-2), err_r
    assert jnp.allclose(out_i, ref_i, atol=2e-2, rtol=2e-2), err_i
    print("KERNEL_OK")
</pallas_src>

<mosaic_0001>
module attributes {stable_mosaic.version = 11 : i64} {
  func.func @_tst_encoder_kernel(%arg0: i32, %arg1: memref<4x8x64xf32, #tpu.memory_space<vmem>>, %arg2: memref<8x64xf32, #tpu.memory_space<vmem>>, %arg3: memref<8x64xf32, #tpu.memory_space<vmem>>, %arg4: memref<1x64xf32, #tpu.memory_space<vmem>>, %arg5: memref<1x64xf32, #tpu.memory_space<vmem>>, %arg6: memref<1x64xf32, #tpu.memory_space<vmem>>, %arg7: memref<64x128xbf16, #tpu.memory_space<vmem>>, %arg8: memref<1x128xf32, #tpu.memory_space<vmem>>, %arg9: memref<128x64xbf16, #tpu.memory_space<vmem>>, %arg10: memref<1x64xf32, #tpu.memory_space<vmem>>, %arg11: memref<4x8x64xf32, #tpu.memory_space<vmem>>) attributes {dimension_semantics = [#tpu.dimension_semantics<parallel>], iteration_bounds = array<i64: 1>, scalar_prefetch = 0 : i64, scratch_operands = 0 : i64, tpu.core_type = #tpu.core_type<tc>, window_params = [{transform_indices = @transform_0, window_bounds = array<i64: 4, 8, 64>}, {transform_indices = @transform_1, window_bounds = array<i64: 8, 64>}, {transform_indices = @transform_2, window_bounds = array<i64: 8, 64>}, {pipeline_mode = #tpu.pipeline_mode<synchronous>, transform_indices = @transform_3, window_bounds = array<i64: 1, 64>}, {pipeline_mode = #tpu.pipeline_mode<synchronous>, transform_indices = @transform_4, window_bounds = array<i64: 1, 64>}, {pipeline_mode = #tpu.pipeline_mode<synchronous>, transform_indices = @transform_5, window_bounds = array<i64: 1, 64>}, {pipeline_mode = #tpu.pipeline_mode<synchronous>, transform_indices = @transform_6, window_bounds = array<i64: 64, 128>}, {pipeline_mode = #tpu.pipeline_mode<synchronous>, transform_indices = @transform_7, window_bounds = array<i64: 1, 128>}, {pipeline_mode = #tpu.pipeline_mode<synchronous>, transform_indices = @transform_8, window_bounds = array<i64: 128, 64>}, {pipeline_mode = #tpu.pipeline_mode<synchronous>, transform_indices = @transform_9, window_bounds = array<i64: 1, 64>}, {transform_indices = @transform_10, window_bounds = array<i64: 4, 8, 64>}]} {
    %c0 = arith.constant 0 : index
    %c0_0 = arith.constant 0 : index
    %c0_1 = arith.constant 0 : index
    %0 = vector.load %arg1[%c0, %c0_0, %c0_1] : memref<4x8x64xf32, #tpu.memory_space<vmem>>, vector<4x8x64xf32>
    %c0_2 = arith.constant 0 : index
    %c0_3 = arith.constant 0 : index
    %1 = vector.load %arg2[%c0_2, %c0_3] : memref<8x64xf32, #tpu.memory_space<vmem>>, vector<8x64xf32>
    %2 = vector.shape_cast %1 : vector<8x64xf32> to vector<1x8x64xf32>
    %3 = vector.broadcast %2 : vector<1x8x64xf32> to vector<4x8x64xf32>
    %4 = arith.mulf %0, %3 : vector<4x8x64xf32>
    %5 = vector.extract_strided_slice %0 {offsets = [0, 0, 32], sizes = [4, 8, 32], strides = [1, 1, 1]} : vector<4x8x64xf32> to vector<4x8x32xf32>
    %6 = vector.extract_strided_slice %0 {offsets = [0, 0, 0], sizes = [4, 8, 32], strides = [1, 1, 1]} : vector<4x8x64xf32> to vector<4x8x32xf32>
    %7 = tpu.concatenate %5, %6 in 2 : vector<4x8x32xf32>, vector<4x8x32xf32> -> vector<4x8x64xf32>
    %c0_4 = arith.constant 0 : index
    %c0_5 = arith.constant 0 : index
    %8 = vector.load %arg3[%c0_4, %c0_5] : memref<8x64xf32, #tpu.memory_space<vmem>>, vector<8x64xf32>
    %9 = vector.shape_cast %8 : vector<8x64xf32> to vector<1x8x64xf32>
    %10 = vector.broadcast %9 : vector<1x8x64xf32> to vector<4x8x64xf32>
    %11 = arith.mulf %7, %10 : vector<4x8x64xf32>
    %12 = arith.addf %4, %11 : vector<4x8x64xf32>
    %c0_6 = arith.constant 0 : index
    %c0_7 = arith.constant 0 : index
    %13 = vector.load %arg4[%c0_6, %c0_7] : memref<1x64xf32, #tpu.memory_space<vmem>>, vector<1x64xf32>
    %c0_8 = arith.constant 0 : index
    %c0_9 = arith.constant 0 : index
    %14 = vector.load %arg5[%c0_8, %c0_9] : memref<1x64xf32, #tpu.memory_space<vmem>>, vector<1x64xf32>
    %c0_10 = arith.constant 0 : index
    %c0_11 = arith.constant 0 : index
    %15 = vector.load %arg6[%c0_10, %c0_11] : memref<1x64xf32, #tpu.memory_space<vmem>>, vector<1x64xf32>
    %cst = arith.constant dense<0.000000e+00> : vector<8x64xf32>
    %16 = vector.multi_reduction <add>, %12, %cst [0] : vector<4x8x64xf32> to vector<8x64xf32>
    %17 = vector.shape_cast %16 : vector<8x64xf32> to vector<1x8x64xf32>
    %cst_12 = arith.constant 4.000000e+00 : f32
    %18 = vector.broadcast %cst_12 : f32 to vector<1x8x64xf32>
    %19 = arith.divf %17, %18 : vector<1x8x64xf32>
    %20 = vector.broadcast %19 : vector<1x8x64xf32> to vector<4x8x64xf32>
    %21 = arith.subf %12, %20 : vector<4x8x64xf32>
    %22 = vector.extract_strided_slice %21 {offsets = [0, 0, 32], sizes = [4, 8, 32], strides = [1, 1, 1]} : vector<4x8x64xf32> to vector<4x8x32xf32>
    %23 = vector.extract_strided_slice %21 {offsets = [0, 0, 0], sizes = [4, 8, 32], strides = [1, 1, 1]} : vector<4x8x64xf32> to vector<4x8x32xf32>
    %24 = tpu.concatenate %22, %23 in 2 : vector<4x8x32xf32>, vector<4x8x32xf32> -> vector<4x8x64xf32>
    %25 = arith.mulf %21, %21 : vector<4x8x64xf32>
    %cst_13 = arith.constant dense<0.000000e+00> : vector<8x64xf32>
    %26 = vector.multi_reduction <add>, %25, %cst_13 [0] : vector<4x8x64xf32> to vector<8x64xf32>
    %cst_14 = arith.constant 4.000000e+00 : f32
    %27 = vector.broadcast %cst_14 : f32 to vector<8x64xf32>
    %28 = arith.divf %26, %27 : vector<8x64xf32>
    %cst_15 = arith.constant 9.99999974E-6 : f32
    %29 = vector.broadcast %cst_15 : f32 to vector<8x64xf32>
    %30 = arith.addf %28, %29 : vector<8x64xf32>
    %31 = arith.mulf %21, %24 : vector<4x8x64xf32>
    %cst_16 = arith.constant dense<0.000000e+00> : vector<8x64xf32>
    %32 = vector.multi_reduction <add>, %31, %cst_16 [0] : vector<4x8x64xf32> to vector<8x64xf32>
    %cst_17 = arith.constant 4.000000e+00 : f32
    %33 = vector.broadcast %cst_17 : f32 to vector<8x64xf32>
    %34 = arith.divf %32, %33 : vector<8x64xf32>
    %35 = vector.extract_strided_slice %30 {offsets = [0, 32], sizes = [8, 32], strides = [1, 1]} : vector<8x64xf32> to vector<8x32xf32>
    %36 = vector.extract_strided_slice %30 {offsets = [0, 0], sizes = [8, 32], strides = [1, 1]} : vector<8x64xf32> to vector<8x32xf32>
    %37 = tpu.concatenate %35, %36 in 1 : vector<8x32xf32>, vector<8x32xf32> -> vector<8x64xf32>
    %38 = arith.mulf %30, %37 : vector<8x64xf32>
    %39 = arith.mulf %34, %34 : vector<8x64xf32>
    %40 = arith.subf %38, %39 : vector<8x64xf32>
    %41 = math.sqrt %40 : vector<8x64xf32>
    %42 = math.rsqrt %40 : vector<8x64xf32>
    %43 = arith.addf %30, %37 : vector<8x64xf32>
    %cst_18 = arith.constant 2.000000e+00 : f32
    %44 = vector.broadcast %cst_18 : f32 to vector<8x64xf32>
    %45 = arith.mulf %44, %41 : vector<8x64xf32>
    %46 = arith.addf %43, %45 : vector<8x64xf32>
    %47 = math.rsqrt %46 : vector<8x64xf32>
    %48 = arith.mulf %42, %47 : vector<8x64xf32>
    %49 = arith.addf %37, %41 : vector<8x64xf32>
    %50 = arith.mulf %49, %48 : vector<8x64xf32>
    %cst_19 = arith.constant 0.000000e+00 : f32
    %51 = vector.broadcast %cst_19 : f32 to vector<8x64xf32>
    %52 = arith.subf %51, %34 : vector<8x64xf32>
    %53 = arith.mulf %52, %48 : vector<8x64xf32>
    %54 = vector.shape_cast %50 : vector<8x64xf32> to vector<1x8x64xf32>
    %55 = vector.broadcast %54 : vector<1x8x64xf32> to vector<4x8x64xf32>
    %56 = arith.mulf %55, %21 : vector<4x8x64xf32>
    %57 = vector.shape_cast %53 : vector<8x64xf32> to vector<1x8x64xf32>
    %58 = vector.broadcast %57 : vector<1x8x64xf32> to vector<4x8x64xf32>
    %59 = arith.mulf %58, %24 : vector<4x8x64xf32>
    %60 = arith.addf %56, %59 : vector<4x8x64xf32>
    %61 = vector.extract_strided_slice %60 {offsets = [0, 0, 32], sizes = [4, 8, 32], strides = [1, 1, 1]} : vector<4x8x64xf32> to vector<4x8x32xf32>
    %62 = vector.extract_strided_slice %60 {offsets = [0, 0, 0], sizes = [4, 8, 32], strides = [1, 1, 1]} : vector<4x8x64xf32> to vector<4x8x32xf32>
    %63 = tpu.concatenate %61, %62 in 2 : vector<4x8x32xf32>, vector<4x8x32xf32> -> vector<4x8x64xf32>
    %64 = vector.shape_cast %13 : vector<1x64xf32> to vector<1x1x64xf32>
    %65 = vector.broadcast %64 : vector<1x1x64xf32> to vector<4x8x64xf32>
    %66 = arith.mulf %65, %60 : vector<4x8x64xf32>
    %67 = vector.shape_cast %14 : vector<1x64xf32> to vector<1x1x64xf32>
    %68 = vector.broadcast %67 : vector<1x1x64xf32> to vector<4x8x64xf32>
    %69 = arith.mulf %68, %63 : vector<4x8x64xf32>
    %70 = arith.addf %66, %69 : vector<4x8x64xf32>
    %71 = vector.shape_cast %15 : vector<1x64xf32> to vector<1x1x64xf32>
    %72 = vector.broadcast %71 : vector<1x1x64xf32> to vector<4x8x64xf32>
    %73 = arith.addf %70, %72 : vector<4x8x64xf32>
    %74 = vector.shape_cast %73 : vector<4x8x64xf32> to vector<32x64xf32>
    %75 = arith.truncf %74 : vector<32x64xf32> to vector<32x64xbf16>
    %c0_20 = arith.constant 0 : index
    %c0_21 = arith.constant 0 : index
    %76 = vector.load %arg7[%c0_20, %c0_21] : memref<64x128xbf16, #tpu.memory_space<vmem>>, vector<64x128xbf16>
    %cst_22 = arith.constant dense<0.000000e+00> : vector<32x128xf32>
    %77 = tpu.matmul %75, %76, %cst_22 {dimension_numbers = #tpu.dot_dimension_numbers<[1], [0], [0], [1], [0, 0, 1, 1], [], []>} : vector<32x64xbf16>, vector<64x128xbf16>, vector<32x128xf32> -> vector<32x128xf32>
    %c0_23 = arith.constant 0 : index
    %c0_24 = arith.constant 0 : index
    %78 = vector.load %arg8[%c0_23, %c0_24] : memref<1x128xf32, #tpu.memory_space<vmem>>, vector<1x128xf32>
    %79 = vector.broadcast %78 : vector<1x128xf32> to vector<32x128xf32>
    %80 = arith.addf %77, %79 : vector<32x128xf32>
    %cst_25 = arith.constant 5.000000e-01 : f32
    %81 = vector.broadcast %cst_25 : f32 to vector<32x128xf32>
    %82 = arith.mulf %81, %80 : vector<32x128xf32>
    %cst_26 = arith.constant 0.797884583 : f32
    %83 = vector.broadcast %cst_26 : f32 to vector<32x128xf32>
    %84 = arith.mulf %83, %80 : vector<32x128xf32>
    %cst_27 = arith.constant 4.471500e-02 : f32
    %85 = vector.broadcast %cst_27 : f32 to vector<32x128xf32>
    %86 = arith.mulf %85, %80 : vector<32x128xf32>
    %87 = arith.mulf %86, %80 : vector<32x128xf32>
    %cst_28 = arith.constant 1.000000e+00 : f32
    %88 = vector.broadcast %cst_28 : f32 to vector<32x128xf32>
    %89 = arith.addf %88, %87 : vector<32x128xf32>
    %90 = arith.mulf %84, %89 : vector<32x128xf32>
    %91 = math.tanh %90 : vector<32x128xf32>
    %cst_29 = arith.constant 1.000000e+00 : f32
    %92 = vector.broadcast %cst_29 : f32 to vector<32x128xf32>
    %93 = arith.addf %92, %91 : vector<32x128xf32>
    %94 = arith.mulf %82, %93 : vector<32x128xf32>
    %95 = arith.truncf %94 : vector<32x128xf32> to vector<32x128xbf16>
    %c0_30 = arith.constant 0 : index
    %c0_31 = arith.constant 0 : index
    %96 = vector.load %arg9[%c0_30, %c0_31] : memref<128x64xbf16, #tpu.memory_space<vmem>>, vector<128x64xbf16>
    %cst_32 = arith.constant dense<0.000000e+00> : vector<32x64xf32>
    %97 = tpu.matmul %95, %96, %cst_32 {dimension_numbers = #tpu.dot_dimension_numbers<[1], [0], [0], [1], [0, 0, 1, 1], [], []>} : vector<32x128xbf16>, vector<128x64xbf16>, vector<32x64xf32> -> vector<32x64xf32>
    %c0_33 = arith.constant 0 : index
    %c0_34 = arith.constant 0 : index
    %98 = vector.load %arg10[%c0_33, %c0_34] : memref<1x64xf32, #tpu.memory_space<vmem>>, vector<1x64xf32>
    %99 = vector.broadcast %98 : vector<1x64xf32> to vector<32x64xf32>
    %100 = arith.addf %97, %99 : vector<32x64xf32>
    %101 = vector.shape_cast %100 : vector<32x64xf32> to vector<4x8x64xf32>
    %102 = arith.addf %73, %101 : vector<4x8x64xf32>
    %cst_35 = arith.constant dense<0.000000e+00> : vector<8x64xf32>
    %103 = vector.multi_reduction <add>, %102, %cst_35 [0] : vector<4x8x64xf32> to vector<8x64xf32>
    %104 = vector.shape_cast %103 : vector<8x64xf32> to vector<1x8x64xf32>
    %cst_36 = arith.constant 4.000000e+00 : f32
    %105 = vector.broadcast %cst_36 : f32 to vector<1x8x64xf32>
    %106 = arith.divf %104, %105 : vector<1x8x64xf32>
    %107 = vector.broadcast %106 : vector<1x8x64xf32> to vector<4x8x64xf32>
    %108 = arith.subf %102, %107 : vector<4x8x64xf32>
    %109 = vector.extract_strided_slice %108 {offsets = [0, 0, 32], sizes = [4, 8, 32], strides = [1, 1, 1]} : vector<4x8x64xf32> to vector<4x8x32xf32>
    %110 = vector.extract_strided_slice %108 {offsets = [0, 0, 0], sizes = [4, 8, 32], strides = [1, 1, 1]} : vector<4x8x64xf32> to vector<4x8x32xf32>
    %111 = tpu.concatenate %109, %110 in 2 : vector<4x8x32xf32>, vector<4x8x32xf32> -> vector<4x8x64xf32>
    %112 = arith.mulf %108, %108 : vector<4x8x64xf32>
    %cst_37 = arith.constant dense<0.000000e+00> : vector<8x64xf32>
    %113 = vector.multi_reduction <add>, %112, %cst_37 [0] : vector<4x8x64xf32> to vector<8x64xf32>
    %cst_38 = arith.constant 4.000000e+00 : f32
    %114 = vector.broadcast %cst_38 : f32 to vector<8x64xf32>
    %115 = arith.divf %113, %114 : vector<8x64xf32>
    %cst_39 = arith.constant 9.99999974E-6 : f32
    %116 = vector.broadcast %cst_39 : f32 to vector<8x64xf32>
    %117 = arith.addf %115, %116 : vector<8x64xf32>
    %118 = arith.mulf %108, %111 : vector<4x8x64xf32>
    %cst_40 = arith.constant dense<0.000000e+00> : vector<8x64xf32>
    %119 = vector.multi_reduction <add>, %118, %cst_40 [0] : vector<4x8x64xf32> to vector<8x64xf32>
    %cst_41 = arith.constant 4.000000e+00 : f32
    %120 = vector.broadcast %cst_41 : f32 to vector<8x64xf32>
    %121 = arith.divf %119, %120 : vector<8x64xf32>
    %122 = vector.extract_strided_slice %117 {offsets = [0, 32], sizes = [8, 32], strides = [1, 1]} : vector<8x64xf32> to vector<8x32xf32>
    %123 = vector.extract_strided_slice %117 {offsets = [0, 0], sizes = [8, 32], strides = [1, 1]} : vector<8x64xf32> to vector<8x32xf32>
    %124 = tpu.concatenate %122, %123 in 1 : vector<8x32xf32>, vector<8x32xf32> -> vector<8x64xf32>
    %125 = arith.mulf %117, %124 : vector<8x64xf32>
    %126 = arith.mulf %121, %121 : vector<8x64xf32>
    %127 = arith.subf %125, %126 : vector<8x64xf32>
    %128 = math.sqrt %127 : vector<8x64xf32>
    %129 = math.rsqrt %127 : vector<8x64xf32>
    %130 = arith.addf %117, %124 : vector<8x64xf32>
    %cst_42 = arith.constant 2.000000e+00 : f32
    %131 = vector.broadcast %cst_42 : f32 to vector<8x64xf32>
    %132 = arith.mulf %131, %128 : vector<8x64xf32>
    %133 = arith.addf %130, %132 : vector<8x64xf32>
    %134 = math.rsqrt %133 : vector<8x64xf32>
    %135 = arith.mulf %129, %134 : vector<8x64xf32>
    %136 = arith.addf %124, %128 : vector<8x64xf32>
    %137 = arith.mulf %136, %135 : vector<8x64xf32>
    %cst_43 = arith.constant 0.000000e+00 : f32
    %138 = vector.broadcast %cst_43 : f32 to vector<8x64xf32>
    %139 = arith.subf %138, %121 : vector<8x64xf32>
    %140 = arith.mulf %139, %135 : vector<8x64xf32>
    %141 = vector.shape_cast %137 : vector<8x64xf32> to vector<1x8x64xf32>
    %142 = vector.broadcast %141 : vector<1x8x64xf32> to vector<4x8x64xf32>
    %143 = arith.mulf %142, %108 : vector<4x8x64xf32>
    %144 = vector.shape_cast %140 : vector<8x64xf32> to vector<1x8x64xf32>
    %145 = vector.broadcast %144 : vector<1x8x64xf32> to vector<4x8x64xf32>
    %146 = arith.mulf %145, %111 : vector<4x8x64xf32>
    %147 = arith.addf %143, %146 : vector<4x8x64xf32>
    %148 = vector.extract_strided_slice %147 {offsets = [0, 0, 32], sizes = [4, 8, 32], strides = [1, 1, 1]} : vector<4x8x64xf32> to vector<4x8x32xf32>
    %149 = vector.extract_strided_slice %147 {offsets = [0, 0, 0], sizes = [4, 8, 32], strides = [1, 1, 1]} : vector<4x8x64xf32> to vector<4x8x32xf32>
    %150 = tpu.concatenate %148, %149 in 2 : vector<4x8x32xf32>, vector<4x8x32xf32> -> vector<4x8x64xf32>
    %151 = vector.shape_cast %13 : vector<1x64xf32> to vector<1x1x64xf32>
    %152 = vector.broadcast %151 : vector<1x1x64xf32> to vector<4x8x64xf32>
    %153 = arith.mulf %152, %147 : vector<4x8x64xf32>
    %154 = vector.shape_cast %14 : vector<1x64xf32> to vector<1x1x64xf32>
    %155 = vector.broadcast %154 : vector<1x1x64xf32> to vector<4x8x64xf32>
    %156 = arith.mulf %155, %150 : vector<4x8x64xf32>
    %157 = arith.addf %153, %156 : vector<4x8x64xf32>
    %158 = vector.shape_cast %15 : vector<1x64xf32> to vector<1x1x64xf32>
    %159 = vector.broadcast %158 : vector<1x1x64xf32> to vector<4x8x64xf32>
    %160 = arith.addf %157, %159 : vector<4x8x64xf32>
    %c0_44 = arith.constant 0 : index
    %c0_45 = arith.constant 0 : index
    %c0_46 = arith.constant 0 : index
    %161 = vector.load %arg11[%c0_44, %c0_45, %c0_46] : memref<4x8x64xf32, #tpu.memory_space<vmem>>, vector<4x8x64xf32>
    tpu.vector_store %arg11[%c0_44, %c0_45, %c0_46], %160 {strides = array<i32>} : memref<4x8x64xf32, #tpu.memory_space<vmem>>, vector<4x8x64xf32>,
    return
  }
  func.func @transform_0(%arg0: i32) -> (i32, i32, i32) {
    %c0_i32 = arith.constant 0 : i32
    %c0_i32_0 = arith.constant 0 : i32
    %c0_i32_1 = arith.constant 0 : i32
    return %c0_i32, %arg0, %c0_i32_0 : i32, i32, i32
  }
  func.func @transform_1(%arg0: i32) -> (i32, i32) {
    %c0_i32 = arith.constant 0 : i32
    %c0_i32_0 = arith.constant 0 : i32
    return %arg0, %c0_i32 : i32, i32
  }
  func.func @transform_2(%arg0: i32) -> (i32, i32) {
    %c0_i32 = arith.constant 0 : i32
    %c0_i32_0 = arith.constant 0 : i32
    return %arg0, %c0_i32 : i32, i32
  }
  func.func @transform_3(%arg0: i32) -> (i32, i32) {
    %c0_i32 = arith.constant 0 : i32
    %c0_i32_0 = arith.constant 0 : i32
    %c0_i32_1 = arith.constant 0 : i32
    return %c0_i32, %c0_i32_0 : i32, i32
  }
  func.func @transform_4(%arg0: i32) -> (i32, i32) {
    %c0_i32 = arith.constant 0 : i32
    %c0_i32_0 = arith.constant 0 : i32
    %c0_i32_1 = arith.constant 0 : i32
    return %c0_i32, %c0_i32_0 : i32, i32
  }
  func.func @transform_5(%arg0: i32) -> (i32, i32) {
    %c0_i32 = arith.constant 0 : i32
    %c0_i32_0 = arith.constant 0 : i32
    %c0_i32_1 = arith.constant 0 : i32
    return %c0_i32, %c0_i32_0 : i32, i32
  }
  func.func @transform_6(%arg0: i32) -> (i32, i32) {
    %c0_i32 = arith.constant 0 : i32
    %c0_i32_0 = arith.constant 0 : i32
    %c0_i32_1 = arith.constant 0 : i32
    return %c0_i32, %c0_i32_0 : i32, i32
  }
  func.func @transform_7(%arg0: i32) -> (i32, i32) {
    %c0_i32 = arith.constant 0 : i32
    %c0_i32_0 = arith.constant 0 : i32
    %c0_i32_1 = arith.constant 0 : i32
    return %c0_i32, %c0_i32_0 : i32, i32
  }
  func.func @transform_8(%arg0: i32) -> (i32, i32) {
    %c0_i32 = arith.constant 0 : i32
    %c0_i32_0 = arith.constant 0 : i32
    %c0_i32_1 = arith.constant 0 : i32
    return %c0_i32, %c0_i32_0 : i32, i32
  }
  func.func @transform_9(%arg0: i32) -> (i32, i32) {
    %c0_i32 = arith.constant 0 : i32
    %c0_i32_0 = arith.constant 0 : i32
    %c0_i32_1 = arith.constant 0 : i32
    return %c0_i32, %c0_i32_0 : i32, i32
  }
  func.func @transform_10(%arg0: i32) -> (i32, i32, i32) {
    %c0_i32 = arith.constant 0 : i32
    %c0_i32_0 = arith.constant 0 : i32
    %c0_i32_1 = arith.constant 0 : i32
    return %c0_i32, %arg0, %c0_i32_0 : i32, i32, i32
  }
}

module attributes {stable_mosaic.version = 11 : i64} {
  func.func @_tst_encoder_kernel(%arg0: i32, %arg1: memref<4x8x64xf32, #tpu.memory_space<vmem>>, %arg2: memref<8x64xf32, #tpu.memory_space<vmem>>, %arg3: memref<8x64xf32, #tpu.memory_space<vmem>>, %arg4: memref<1x64xf32, #tpu.memory_space<vmem>>, %arg5: memref<1x64xf32, #tpu.memory_space<vmem>>, %arg6: memref<1x64xf32, #tpu.memory_space<vmem>>, %arg7: memref<64x128xbf16, #tpu.memory_space<vmem>>, %arg8: memref<1x128xf32, #tpu.memory_space<vmem>>, %arg9: memref<128x64xbf16, #tpu.memory_space<vmem>>, %arg10: memref<1x64xf32, #tpu.memory_space<vmem>>, %arg11: memref<4x8x64xf32, #tpu.memory_space<vmem>>) attributes {dimension_semantics = [#tpu.dimension_semantics<parallel>], iteration_bounds = array<i64: 1>, scalar_prefetch = 0 : i64, scratch_operands = 0 : i64, tpu.core_type = #tpu.core_type<tc>, window_params = [{transform_indices = @transform_0, window_bounds = array<i64: 4, 8, 64>}, {transform_indices = @transform_1, window_bounds = array<i64: 8, 64>}, {transform_indices = @transform_2, window_bounds = array<i64: 8, 64>}, {pipeline_mode = #tpu.pipeline_mode<synchronous>, transform_indices = @transform_3, window_bounds = array<i64: 1, 64>}, {pipeline_mode = #tpu.pipeline_mode<synchronous>, transform_indices = @transform_4, window_bounds = array<i64: 1, 64>}, {pipeline_mode = #tpu.pipeline_mode<synchronous>, transform_indices = @transform_5, window_bounds = array<i64: 1, 64>}, {pipeline_mode = #tpu.pipeline_mode<synchronous>, transform_indices = @transform_6, window_bounds = array<i64: 64, 128>}, {pipeline_mode = #tpu.pipeline_mode<synchronous>, transform_indices = @transform_7, window_bounds = array<i64: 1, 128>}, {pipeline_mode = #tpu.pipeline_mode<synchronous>, transform_indices = @transform_8, window_bounds = array<i64: 128, 64>}, {pipeline_mode = #tpu.pipeline_mode<synchronous>, transform_indices = @transform_9, window_bounds = array<i64: 1, 64>}, {transform_indices = @transform_10, window_bounds = array<i64: 4, 8, 64>}]} {
    %c0 = arith.constant 0 : index
    %c0_0 = arith.constant 0 : index
    %c0_1 = arith.constant 0 : index
    %0 = vector.load %arg1[%c0, %c0_0, %c0_1] : memref<4x8x64xf32, #tpu.memory_space<vmem>>, vector<4x8x64xf32>
    %c0_2 = arith.constant 0 : index
    %c0_3 = arith.constant 0 : index
    %1 = vector.load %arg2[%c0_2, %c0_3] : memref<8x64xf32, #tpu.memory_space<vmem>>, vector<8x64xf32>
    %2 = vector.shape_cast %1 : vector<8x64xf32> to vector<1x8x64xf32>
    %3 = vector.broadcast %2 : vector<1x8x64xf32> to vector<4x8x64xf32>
    %4 = arith.mulf %0, %3 : vector<4x8x64xf32>
    %5 = vector.extract_strided_slice %0 {offsets = [0, 0, 32], sizes = [4, 8, 32], strides = [1, 1, 1]} : vector<4x8x64xf32> to vector<4x8x32xf32>
    %6 = vector.extract_strided_slice %0 {offsets = [0, 0, 0], sizes = [4, 8, 32], strides = [1, 1, 1]} : vector<4x8x64xf32> to vector<4x8x32xf32>
    %7 = tpu.concatenate %5, %6 in 2 : vector<4x8x32xf32>, vector<4x8x32xf32> -> vector<4x8x64xf32>
    %c0_4 = arith.constant 0 : index
    %c0_5 = arith.constant 0 : index
    %8 = vector.load %arg3[%c0_4, %c0_5] : memref<8x64xf32, #tpu.memory_space<vmem>>, vector<8x64xf32>
    %9 = vector.shape_cast %8 : vector<8x64xf32> to vector<1x8x64xf32>
    %10 = vector.broadcast %9 : vector<1x8x64xf32> to vector<4x8x64xf32>
    %11 = arith.mulf %7, %10 : vector<4x8x64xf32>
    %12 = arith.addf %4, %11 : vector<4x8x64xf32>
    %c0_6 = arith.constant 0 : index
    %c0_7 = arith.constant 0 : index
    %13 = vector.load %arg4[%c0_6, %c0_7] : memref<1x64xf32, #tpu.memory_space<vmem>>, vector<1x64xf32>
    %c0_8 = arith.constant 0 : index
    %c0_9 = arith.constant 0 : index
    %14 = vector.load %arg5[%c0_8, %c0_9] : memref<1x64xf32, #tpu.memory_space<vmem>>, vector<1x64xf32>
    %c0_10 = arith.constant 0 : index
    %c0_11 = arith.constant 0 : index
    %15 = vector.load %arg6[%c0_10, %c0_11] : memref<1x64xf32, #tpu.memory_space<vmem>>, vector<1x64xf32>
    %cst = arith.constant dense<0.000000e+00> : vector<8x64xf32>
    %16 = vector.multi_reduction <add>, %12, %cst [0] : vector<4x8x64xf32> to vector<8x64xf32>
    %17 = vector.shape_cast %16 : vector<8x64xf32> to vector<1x8x64xf32>
    %cst_12 = arith.constant 4.000000e+00 : f32
    %18 = vector.broadcast %cst_12 : f32 to vector<1x8x64xf32>
    %19 = arith.divf %17, %18 : vector<1x8x64xf32>
    %20 = vector.broadcast %19 : vector<1x8x64xf32> to vector<4x8x64xf32>
    %21 = arith.subf %12, %20 : vector<4x8x64xf32>
    %22 = vector.extract_strided_slice %21 {offsets = [0, 0, 32], sizes = [4, 8, 32], strides = [1, 1, 1]} : vector<4x8x64xf32> to vector<4x8x32xf32>
    %23 = vector.extract_strided_slice %21 {offsets = [0, 0, 0], sizes = [4, 8, 32], strides = [1, 1, 1]} : vector<4x8x64xf32> to vector<4x8x32xf32>
    %24 = tpu.concatenate %22, %23 in 2 : vector<4x8x32xf32>, vector<4x8x32xf32> -> vector<4x8x64xf32>
    %25 = arith.mulf %21, %21 : vector<4x8x64xf32>
    %cst_13 = arith.constant dense<0.000000e+00> : vector<8x64xf32>
    %26 = vector.multi_reduction <add>, %25, %cst_13 [0] : vector<4x8x64xf32> to vector<8x64xf32>
    %cst_14 = arith.constant 4.000000e+00 : f32
    %27 = vector.broadcast %cst_14 : f32 to vector<8x64xf32>
    %28 = arith.divf %26, %27 : vector<8x64xf32>
    %cst_15 = arith.constant 9.99999974E-6 : f32
    %29 = vector.broadcast %cst_15 : f32 to vector<8x64xf32>
    %30 = arith.addf %28, %29 : vector<8x64xf32>
    %31 = arith.mulf %21, %24 : vector<4x8x64xf32>
    %cst_16 = arith.constant dense<0.000000e+00> : vector<8x64xf32>
    %32 = vector.multi_reduction <add>, %31, %cst_16 [0] : vector<4x8x64xf32> to vector<8x64xf32>
    %cst_17 = arith.constant 4.000000e+00 : f32
    %33 = vector.broadcast %cst_17 : f32 to vector<8x64xf32>
    %34 = arith.divf %32, %33 : vector<8x64xf32>
    %35 = vector.extract_strided_slice %30 {offsets = [0, 32], sizes = [8, 32], strides = [1, 1]} : vector<8x64xf32> to vector<8x32xf32>
    %36 = vector.extract_strided_slice %30 {offsets = [0, 0], sizes = [8, 32], strides = [1, 1]} : vector<8x64xf32> to vector<8x32xf32>
    %37 = tpu.concatenate %35, %36 in 1 : vector<8x32xf32>, vector<8x32xf32> -> vector<8x64xf32>
    %38 = arith.mulf %30, %37 : vector<8x64xf32>
    %39 = arith.mulf %34, %34 : vector<8x64xf32>
    %40 = arith.subf %38, %39 : vector<8x64xf32>
    %41 = math.sqrt %40 : vector<8x64xf32>
    %42 = math.rsqrt %40 : vector<8x64xf32>
    %43 = arith.addf %30, %37 : vector<8x64xf32>
    %cst_18 = arith.constant 2.000000e+00 : f32
    %44 = vector.broadcast %cst_18 : f32 to vector<8x64xf32>
    %45 = arith.mulf %44, %41 : vector<8x64xf32>
    %46 = arith.addf %43, %45 : vector<8x64xf32>
    %47 = math.rsqrt %46 : vector<8x64xf32>
    %48 = arith.mulf %42, %47 : vector<8x64xf32>
    %49 = arith.addf %37, %41 : vector<8x64xf32>
    %50 = arith.mulf %49, %48 : vector<8x64xf32>
    %cst_19 = arith.constant 0.000000e+00 : f32
    %51 = vector.broadcast %cst_19 : f32 to vector<8x64xf32>
    %52 = arith.subf %51, %34 : vector<8x64xf32>
    %53 = arith.mulf %52, %48 : vector<8x64xf32>
    %54 = vector.shape_cast %50 : vector<8x64xf32> to vector<1x8x64xf32>
    %55 = vector.broadcast %54 : vector<1x8x64xf32> to vector<4x8x64xf32>
    %56 = arith.mulf %55, %21 : vector<4x8x64xf32>
    %57 = vector.shape_cast %53 : vector<8x64xf32> to vector<1x8x64xf32>
    %58 = vector.broadcast %57 : vector<1x8x64xf32> to vector<4x8x64xf32>
    %59 = arith.mulf %58, %24 : vector<4x8x64xf32>
    %60 = arith.addf %56, %59 : vector<4x8x64xf32>
    %61 = vector.extract_strided_slice %60 {offsets = [0, 0, 32], sizes = [4, 8, 32], strides = [1, 1, 1]} : vector<4x8x64xf32> to vector<4x8x32xf32>
    %62 = vector.extract_strided_slice %60 {offsets = [0, 0, 0], sizes = [4, 8, 32], strides = [1, 1, 1]} : vector<4x8x64xf32> to vector<4x8x32xf32>
    %63 = tpu.concatenate %61, %62 in 2 : vector<4x8x32xf32>, vector<4x8x32xf32> -> vector<4x8x64xf32>
    %64 = vector.shape_cast %13 : vector<1x64xf32> to vector<1x1x64xf32>
    %65 = vector.broadcast %64 : vector<1x1x64xf32> to vector<4x8x64xf32>
    %66 = arith.mulf %65, %60 : vector<4x8x64xf32>
    %67 = vector.shape_cast %14 : vector<1x64xf32> to vector<1x1x64xf32>
    %68 = vector.broadcast %67 : vector<1x1x64xf32> to vector<4x8x64xf32>
    %69 = arith.mulf %68, %63 : vector<4x8x64xf32>
    %70 = arith.addf %66, %69 : vector<4x8x64xf32>
    %71 = vector.shape_cast %15 : vector<1x64xf32> to vector<1x1x64xf32>
    %72 = vector.broadcast %71 : vector<1x1x64xf32> to vector<4x8x64xf32>
    %73 = arith.addf %70, %72 : vector<4x8x64xf32>
    %74 = vector.shape_cast %73 : vector<4x8x64xf32> to vector<32x64xf32>
    %75 = arith.truncf %74 : vector<32x64xf32> to vector<32x64xbf16>
    %c0_20 = arith.constant 0 : index
    %c0_21 = arith.constant 0 : index
    %76 = vector.load %arg7[%c0_20, %c0_21] : memref<64x128xbf16, #tpu.memory_space<vmem>>, vector<64x128xbf16>
    %cst_22 = arith.constant dense<0.000000e+00> : vector<32x128xf32>
    %77 = tpu.matmul %75, %76, %cst_22 {dimension_numbers = #tpu.dot_dimension_numbers<[1], [0], [0], [1], [0, 0, 1, 1], [], []>} : vector<32x64xbf16>, vector<64x128xbf16>, vector<32x128xf32> -> vector<32x128xf32>
    %c0_23 = arith.constant 0 : index
    %c0_24 = arith.constant 0 : index
    %78 = vector.load %arg8[%c0_23, %c0_24] : memref<1x128xf32, #tpu.memory_space<vmem>>, vector<1x128xf32>
    %79 = vector.broadcast %78 : vector<1x128xf32> to vector<32x128xf32>
    %80 = arith.addf %77, %79 : vector<32x128xf32>
    %cst_25 = arith.constant 5.000000e-01 : f32
    %81 = vector.broadcast %cst_25 : f32 to vector<32x128xf32>
    %82 = arith.mulf %81, %80 : vector<32x128xf32>
    %cst_26 = arith.constant 0.797884583 : f32
    %83 = vector.broadcast %cst_26 : f32 to vector<32x128xf32>
    %84 = arith.mulf %83, %80 : vector<32x128xf32>
    %cst_27 = arith.constant 4.471500e-02 : f32
    %85 = vector.broadcast %cst_27 : f32 to vector<32x128xf32>
    %86 = arith.mulf %85, %80 : vector<32x128xf32>
    %87 = arith.mulf %86, %80 : vector<32x128xf32>
    %cst_28 = arith.constant 1.000000e+00 : f32
    %88 = vector.broadcast %cst_28 : f32 to vector<32x128xf32>
    %89 = arith.addf %88, %87 : vector<32x128xf32>
    %90 = arith.mulf %84, %89 : vector<32x128xf32>
    %91 = math.tanh %90 : vector<32x128xf32>
    %cst_29 = arith.constant 1.000000e+00 : f32
    %92 = vector.broadcast %cst_29 : f32 to vector<32x128xf32>
    %93 = arith.addf %92, %91 : vector<32x128xf32>
    %94 = arith.mulf %82, %93 : vector<32x128xf32>
    %95 = arith.truncf %94 : vector<32x128xf32> to vector<32x128xbf16>
    %c0_30 = arith.constant 0 : index
    %c0_31 = arith.constant 0 : index
    %96 = vector.load %arg9[%c0_30, %c0_31] : memref<128x64xbf16, #tpu.memory_space<vmem>>, vector<128x64xbf16>
    %cst_32 = arith.constant dense<0.000000e+00> : vector<32x64xf32>
    %97 = tpu.matmul %95, %96, %cst_32 {dimension_numbers = #tpu.dot_dimension_numbers<[1], [0], [0], [1], [0, 0, 1, 1], [], []>} : vector<32x128xbf16>, vector<128x64xbf16>, vector<32x64xf32> -> vector<32x64xf32>
    %c0_33 = arith.constant 0 : index
    %c0_34 = arith.constant 0 : index
    %98 = vector.load %arg10[%c0_33, %c0_34] : memref<1x64xf32, #tpu.memory_space<vmem>>, vector<1x64xf32>
    %99 = vector.broadcast %98 : vector<1x64xf32> to vector<32x64xf32>
    %100 = arith.addf %97, %99 : vector<32x64xf32>
    %101 = vector.shape_cast %100 : vector<32x64xf32> to vector<4x8x64xf32>
    %102 = arith.addf %73, %101 : vector<4x8x64xf32>
    %cst_35 = arith.constant dense<0.000000e+00> : vector<8x64xf32>
    %103 = vector.multi_reduction <add>, %102, %cst_35 [0] : vector<4x8x64xf32> to vector<8x64xf32>
    %104 = vector.shape_cast %103 : vector<8x64xf32> to vector<1x8x64xf32>
    %cst_36 = arith.constant 4.000000e+00 : f32
    %105 = vector.broadcast %cst_36 : f32 to vector<1x8x64xf32>
    %106 = arith.divf %104, %105 : vector<1x8x64xf32>
    %107 = vector.broadcast %106 : vector<1x8x64xf32> to vector<4x8x64xf32>
    %108 = arith.subf %102, %107 : vector<4x8x64xf32>
    %109 = vector.extract_strided_slice %108 {offsets = [0, 0, 32], sizes = [4, 8, 32], strides = [1, 1, 1]} : vector<4x8x64xf32> to vector<4x8x32xf32>
    %110 = vector.extract_strided_slice %108 {offsets = [0, 0, 0], sizes = [4, 8, 32], strides = [1, 1, 1]} : vector<4x8x64xf32> to vector<4x8x32xf32>
    %111 = tpu.concatenate %109, %110 in 2 : vector<4x8x32xf32>, vector<4x8x32xf32> -> vector<4x8x64xf32>
    %112 = arith.mulf %108, %108 : vector<4x8x64xf32>
    %cst_37 = arith.constant dense<0.000000e+00> : vector<8x64xf32>
    %113 = vector.multi_reduction <add>, %112, %cst_37 [0] : vector<4x8x64xf32> to vector<8x64xf32>
    %cst_38 = arith.constant 4.000000e+00 : f32
    %114 = vector.broadcast %cst_38 : f32 to vector<8x64xf32>
    %115 = arith.divf %113, %114 : vector<8x64xf32>
    %cst_39 = arith.constant 9.99999974E-6 : f32
    %116 = vector.broadcast %cst_39 : f32 to vector<8x64xf32>
    %117 = arith.addf %115, %116 : vector<8x64xf32>
    %118 = arith.mulf %108, %111 : vector<4x8x64xf32>
    %cst_40 = arith.constant dense<0.000000e+00> : vector<8x64xf32>
    %119 = vector.multi_reduction <add>, %118, %cst_40 [0] : vector<4x8x64xf32> to vector<8x64xf32>
    %cst_41 = arith.constant 4.000000e+00 : f32
    %120 = vector.broadcast %cst_41 : f32 to vector<8x64xf32>
    %121 = arith.divf %119, %120 : vector<8x64xf32>
    %122 = vector.extract_strided_slice %117 {offsets = [0, 32], sizes = [8, 32], strides = [1, 1]} : vector<8x64xf32> to vector<8x32xf32>
    %123 = vector.extract_strided_slice %117 {offsets = [0, 0], sizes = [8, 32], strides = [1, 1]} : vector<8x64xf32> to vector<8x32xf32>
    %124 = tpu.concatenate %122, %123 in 1 : vector<8x32xf32>, vector<8x32xf32> -> vector<8x64xf32>
    %125 = arith.mulf %117, %124 : vector<8x64xf32>
    %126 = arith.mulf %121, %121 : vector<8x64xf32>
    %127 = arith.subf %125, %126 : vector<8x64xf32>
    %128 = math.sqrt %127 : vector<8x64xf32>
    %129 = math.rsqrt %127 : vector<8x64xf32>
    %130 = arith.addf %117, %124 : vector<8x64xf32>
    %cst_42 = arith.constant 2.000000e+00 : f32
    %131 = vector.broadcast %cst_42 : f32 to vector<8x64xf32>
    %132 = arith.mulf %131, %128 : vector<8x64xf32>
    %133 = arith.addf %130, %132 : vector<8x64xf32>
    %134 = math.rsqrt %133 : vector<8x64xf32>
    %135 = arith.mulf %129, %134 : vector<8x64xf32>
    %136 = arith.addf %124, %128 : vector<8x64xf32>
    %137 = arith.mulf %136, %135 : vector<8x64xf32>
    %cst_43 = arith.constant 0.000000e+00 : f32
    %138 = vector.broadcast %cst_43 : f32 to vector<8x64xf32>
    %139 = arith.subf %138, %121 : vector<8x64xf32>
    %140 = arith.mulf %139, %135 : vector<8x64xf32>
    %141 = vector.shape_cast %137 : vector<8x64xf32> to vector<1x8x64xf32>
    %142 = vector.broadcast %141 : vector<1x8x64xf32> to vector<4x8x64xf32>
    %143 = arith.mulf %142, %108 : vector<4x8x64xf32>
    %144 = vector.shape_cast %140 : vector<8x64xf32> to vector<1x8x64xf32>
    %145 = vector.broadcast %144 : vector<1x8x64xf32> to vector<4x8x64xf32>
    %146 = arith.mulf %145, %111 : vector<4x8x64xf32>
    %147 = arith.addf %143, %146 : vector<4x8x64xf32>
    %148 = vector.extract_strided_slice %147 {offsets = [0, 0, 32], sizes = [4, 8, 32], strides = [1, 1, 1]} : vector<4x8x64xf32> to vector<4x8x32xf32>
    %149 = vector.extract_strided_slice %147 {offsets = [0, 0, 0], sizes = [4, 8, 32], strides = [1, 1, 1]} : vector<4x8x64xf32> to vector<4x8x32xf32>
    %150 = tpu.concatenate %148, %149 in 2 : vector<4x8x32xf32>, vector<4x8x32xf32> -> vector<4x8x64xf32>
    %151 = vector.shape_cast %13 : vector<1x64xf32> to vector<1x1x64xf32>
    %152 = vector.broadcast %151 : vector<1x1x64xf32> to vector<4x8x64xf32>
    %153 = arith.mulf %152, %147 : vector<4x8x64xf32>
    %154 = vector.shape_cast %14 : vector<1x64xf32> to vector<1x1x64xf32>
    %155 = vector.broadcast %154 : vector<1x1x64xf32> to vector<4x8x64xf32>
    %156 = arith.mulf %155, %150 : vector<4x8x64xf32>
    %157 = arith.addf %153, %156 : vector<4x8x64xf32>
    %158 = vector.shape_cast %15 : vector<1x64xf32> to vector<1x1x64xf32>
    %159 = vector.broadcast %158 : vector<1x1x64xf32> to vector<4x8x64xf32>
    %160 = arith.addf %157, %159 : vector<4x8x64xf32>
    %c0_44 = arith.constant 0 : index
    %c0_45 = arith.constant 0 : index
    %c0_46 = arith.constant 0 : index
    %161 = vector.load %arg11[%c0_44, %c0_45, %c0_46] : memref<4x8x64xf32, #tpu.memory_space<vmem>>, vector<4x8x64xf32>
    tpu.vector_store %arg11[%c0_44, %c0_45, %c0_46], %160 {strides = array<i32>} : memref<4x8x64xf32, #tpu.memory_space<vmem>>, vector<4x8x64xf32>,
    return
  }
  func.func @transform_0(%arg0: i32) -> (i32, i32, i32) {
    %c0_i32 = arith.constant 0 : i32
    %c0_i32_0 = arith.constant 0 : i32
    %c0_i32_1 = arith.constant 0 : i32
    return %c0_i32, %arg0, %c0_i32_0 : i32, i32, i32
  }
  func.func @transform_1(%arg0: i32) -> (i32, i32) {
    %c0_i32 = arith.constant 0 : i32
    %c0_i32_0 = arith.constant 0 : i32
    return %arg0, %c0_i32 : i32, i32
  }
  func.func @transform_2(%arg0: i32) -> (i32, i32) {
    %c0_i32 = arith.constant 0 : i32
    %c0_i32_0 = arith.constant 0 : i32
    return %arg0, %c0_i32 : i32, i32
  }
  func.func @transform_3(%arg0: i32) -> (i32, i32) {
    %c0_i32 = arith.constant 0 : i32
    %c0_i32_0 = arith.constant 0 : i32
    %c0_i32_1 = arith.constant 0 : i32
    return %c0_i32, %c0_i32_0 : i32, i32
  }
  func.func @transform_4(%arg0: i32) -> (i32, i32) {
    %c0_i32 = arith.constant 0 : i32
    %c0_i32_0 = arith.constant 0 : i32
    %c0_i32_1 = arith.constant 0 : i32
    return %c0_i32, %c0_i32_0 : i32, i32
  }
  func.func @transform_5(%arg0: i32) -> (i32, i32) {
    %c0_i32 = arith.constant 0 : i32
    %c0_i32_0 = arith.constant 0 : i32
    %c0_i32_1 = arith.constant 0 : i32
    return %c0_i32, %c0_i32_0 : i32, i32
  }
  func.func @transform_6(%arg0: i32) -> (i32, i32) {
    %c0_i32 = arith.constant 0 : i32
    %c0_i32_0 = arith.constant 0 : i32
    %c0_i32_1 = arith.constant 0 : i32
    return %c0_i32, %c0_i32_0 : i32, i32
  }
  func.func @transform_7(%arg0: i32) -> (i32, i32) {
    %c0_i32 = arith.constant 0 : i32
    %c0_i32_0 = arith.constant 0 : i32
    %c0_i32_1 = arith.constant 0 : i32
    return %c0_i32, %c0_i32_0 : i32, i32
  }
  func.func @transform_8(%arg0: i32) -> (i32, i32) {
    %c0_i32 = arith.constant 0 : i32
    %c0_i32_0 = arith.constant 0 : i32
    %c0_i32_1 = arith.constant 0 : i32
    return %c0_i32, %c0_i32_0 : i32, i32
  }
  func.func @transform_9(%arg0: i32) -> (i32, i32) {
    %c0_i32 = arith.constant 0 : i32
    %c0_i32_0 = arith.constant 0 : i32
    %c0_i32_1 = arith.constant 0 : i32
    return %c0_i32, %c0_i32_0 : i32, i32
  }
  func.func @transform_10(%arg0: i32) -> (i32, i32, i32) {
    %c0_i32 = arith.constant 0 : i32
    %c0_i32_0 = arith.constant 0 : i32
    %c0_i32_1 = arith.constant 0 : i32
    return %c0_i32, %arg0, %c0_i32_0 : i32, i32, i32
  }
}

</mosaic_0001>

<bundles_post_ra>
// kernel: _encoder_impl.1
= control target key start
LH: loop header
LB: loop body
LE: loop exit
PB: predicated region body
PF: predicated region fallthrough
CT: control target
= control target key end

     0   :  { %s787_s15 = smov 32   ;;  %s788_s16 = smov 96   ;;  %vm73_vm0 = vcmask 261120   ;;  %vm90_vm1 = vcmask 523264   ;;  %s1131_s0 = inlined_call_operand.vmem [shape: f32[4,8,64], index: 0, kind: input, shape index: {}]   ;;  %s1132_s1 = inlined_call_operand.vmem [shape: f32[8,64], index: 1, kind: input, shape index: {}]   ;;  %s1133_s2 = inlined_call_operand.vmem [shape: f32[8,64], index: 2, kind: input, shape index: {}]   ;;  %s1134_s6 = inlined_call_operand.vmem [shape: bf16[64,128], index: 6, kind: input, shape index: {}]   ;;  %s1135_s3 = inlined_call_operand.vmem [shape: f32[1,64], index: 3, kind: input, shape index: {}]   ;;  %s1136_s4 = inlined_call_operand.vmem [shape: f32[1,64], index: 4, kind: input, shape index: {}]   ;;  %s1137_s5 = inlined_call_operand.vmem [shape: f32[1,64], index: 5, kind: input, shape index: {}]   ;;  %s1138_s8 = inlined_call_operand.vmem [shape: bf16[128,64], index: 8, kind: input, shape index: {}]   ;;  %s1139_s7 = inlined_call_operand.vmem [shape: f32[1,128], index: 7, kind: input, shape index: {}]   ;;  %s1140_s9 = inlined_call_operand.vmem [shape: f32[1,64], index: 9, kind: input, shape index: {}]   ;;  %s1141_s10 = inlined_call_operand.vmem [shape: f32[4,8,64], index: 10, kind: output, shape index: {}]  }
   0x1   :  { %v36_v0 = vld [vmem:[%s1131_s0] sm:$0xff]  ;;  %v37_v1 = vld [vmem:[%s1131_s0 + $0x8] sm:$0xff]  ;;  %v38_v2 = vld [vmem:[%s1131_s0 + $0x10] sm:$0xff] }
   0x2   :  { %61 = vrot.lane.b32.xlu1 %v36_v0, %s787_s15  ;;  %49 = vrot.lane.b32.xlu0 %v36_v0, %s788_s16  ;;  %v39_v3 = vld [vmem:[%s1131_s0 + $0x18] sm:$0xff]  ;;  %v40_v4 = vld [vmem:[%s1132_s1] sm:$0xff] }
   0x3   :  { %v78_v5 = vld [vmem:[%s1133_s2] sm:$0xff]  ;;  %v41_v9 = vmul.f32 %v40_v4, %v36_v0  ;;  %v42_v11 = vmul.f32 %v40_v4, %v37_v1  ;;  %v43_v17 = vmul.f32 %v40_v4, %v38_v2  ;;  %v44_v26 = vmul.f32 %v40_v4, %v39_v3 }
   0x6   :  { %63 = vrot.lane.b32.xlu1 %v37_v1, %s787_s15  ;;  %51 = vrot.lane.b32.xlu0 %v37_v1, %s788_s16 }
   0xa   :  { %65 = vrot.lane.b32.xlu1 %v38_v2, %s787_s15  ;;  %53 = vrot.lane.b32.xlu0 %v38_v2, %s788_s16 }
   0xe   :  { %67 = vrot.lane.b32.xlu1 %v39_v3, %s787_s15  ;;  %55 = vrot.lane.b32.xlu0 %v39_v3, %s788_s16 }
  0x74   :  { %v62_v6 = vpop.permute.xlu1 %61  ;;  %v50_v7 = vpop.permute.xlu0 %49 }
  0x75   :  { %v74_v8 = vsel %vm73_vm0, %v50_v7, %v62_v6 }
  0x76   :  { %v79_v10 = vmul.f32 %v78_v5, %v74_v8 }
  0x78   :  { %v64_v12 = vpop.permute.xlu1 %63  ;;  %v52_v13 = vpop.permute.xlu0 %51  ;;  %v83_v15 = vadd.f32 %v79_v10, %v41_v9 }
  0x79   :  { %v75_v14 = vsel %vm73_vm0, %v52_v13, %v64_v12 }
  0x7a   :  { %v80_v16 = vmul.f32 %v78_v5, %v75_v14  ;;  %v91_v22 = vsel %vm90_vm1, %v83_v15, 0.0 }
  0x7c   :  { %v84_v18 = vadd.f32 %v80_v16, %v42_v11  ;;  %v66_v19 = vpop.permute.xlu1 %65  ;;  %v54_v20 = vpop.permute.xlu0 %53 }
  0x7d   :  { %v76_v21 = vsel %vm73_vm0, %v54_v20, %v66_v19 }
  0x7e   :  { %v92_v23 = vsel %vm90_vm1, %v84_v18, 0.0  ;;  %v81_v24 = vmul.f32 %v78_v5, %v76_v21 }
  0x7f   :  { %v93_v25 = vadd.f32 %v92_v23, %v91_v22 }
  0x80   :  { %v85_v27 = vadd.f32 %v81_v24, %v43_v17  ;;  %v68_v28 = vpop.permute.xlu1 %67  ;;  %v56_v29 = vpop.permute.xlu0 %55 }
  0x81   :  { %v77_v30 = vsel %vm73_vm0, %v56_v29, %v68_v28 }
  0x82   :  { %v94_v31 = vsel %vm90_vm1, %v85_v27, 0.0  ;;  %v82_v32 = vmul.f32 %v78_v5, %v77_v30 }
  0x83   :  { %v95_v33 = vadd.f32 %v94_v31, %v93_v25  ;;  %v759_v31 = vld [vmem:[%s1134_s6 + $0x18] sm:$0xff]  }
  0x84   :  { %v86_v34 = vadd.f32 %v82_v32, %v44_v26  ;;  %725 = vmatprep.subr.bf16.mxu0 %v759_v31 }
  0x85   :  { %726 = vmatpush3.bf16.msra.mxu0 %v759_v31 }
  0x86   :  { %v96_v35 = vsel %vm90_vm1, %v86_v34, 0.0 }
  0x87   :  { %v97_v36 = vadd.f32 %v96_v35, %v95_v33 }
  0x89   :  { %v99_v37 = vmul.f32 0.25, %v97_v36  ;;  %v760_v36 = vld [vmem:[%s1134_s6 + $0x10] sm:$0xff]  }
  0x8a   :  { %727 = vmatprep.subr.bf16.mxu0 %v760_v36 }
  0x8b   :  { %v878_v38 = vsub.f32 %v86_v34, %v99_v37  ;;  %v880_v39 = vsub.f32 %v84_v18, %v99_v37  ;;  %v882_v40 = vsub.f32 %v83_v15, %v99_v37  ;;  %v884_v41 = vsub.f32 %v85_v27, %v99_v37  ;;  %728 = vmatpush3.bf16.msra.mxu0 %v760_v36 }
  0x8d   :  { %110 = vrot.lane.b32.xlu1 %v880_v39, %s788_s16  ;;  %108 = vrot.lane.b32.xlu0 %v882_v40, %s788_s16  ;;  %v136_v42 = vmul.f32 %v882_v40, %v882_v40  ;;  %v137_v43 = vmul.f32 %v880_v39, %v880_v39  ;;  %v138_v44 = vmul.f32 %v884_v41, %v884_v41 }
  0x8e   :  { %v139_v45 = vmul.f32 %v878_v38, %v878_v38 }
  0x8f   :  { %v140_v46 = vsel %vm90_vm1, %v136_v42, 0.0  ;;  %v141_v47 = vsel %vm90_vm1, %v137_v43, 0.0  ;;  %v143_v49 = vsel %vm90_vm1, %v138_v44, 0.0 }
  0x90   :  { %v142_v48 = vadd.f32 %v141_v47, %v140_v46  ;;  %v145_v51 = vsel %vm90_vm1, %v139_v45, 0.0  ;;  %v761_v47 = vld [vmem:[%s1134_s6 + $0x8] sm:$0xff]  }
  0x91   :  { %122 = vrot.lane.b32.xlu1 %v880_v39, %s787_s15  ;;  %120 = vrot.lane.b32.xlu0 %v882_v40, %s787_s15 }
  0x92   :  { %v144_v50 = vadd.f32 %v143_v49, %v142_v48  ;;  %729 = vmatprep.subr.bf16.mxu0 %v761_v47 }
  0x93   :  { %730 = vmatpush3.bf16.msra.mxu0 %v761_v47 }
  0x94   :  { %v146_v52 = vadd.f32 %v145_v51, %v144_v50  ;;  %v762_v50 = vld [vmem:[%s1134_s6] sm:$0xff]  }
  0x95   :  { %124 = vrot.lane.b32.xlu1 %v884_v41, %s787_s15  ;;  %112 = vrot.lane.b32.xlu0 %v884_v41, %s788_s16 }
  0x96   :  { %v147_v53 = vmul.f32 0.25, %v146_v52  ;;  %731 = vmatprep.subr.bf16.mxu0 %v762_v50 }
  0x97   :  { %732 = vmatpush3.bf16.msra.mxu0 %v762_v50 }
  0x98   :  { %v148_v54 = vadd.f32 1e-05, %v147_v53  ;;  %v956_v53 = vld [vmem:[%s1135_s3] ss:$0 sm:$0xff] }
  0x99   :  { %126 = vrot.lane.b32.xlu1 %v878_v38, %s787_s15  ;;  %114 = vrot.lane.b32.xlu0 %v878_v38, %s788_s16 }
  0x9d   :  { %165 = vrot.lane.b32.xlu1 %v148_v54, %s787_s15  ;;  %162 = vrot.lane.b32.xlu0 %v148_v54, %s788_s16 }
  0xff   :  { %v111_v55 = vpop.permute.xlu1 %110  ;;  %v109_v56 = vpop.permute.xlu0 %108 }
 0x103   :  { %v123_v57 = vpop.permute.xlu1 %122  ;;  %v121_v58 = vpop.permute.xlu0 %120 }
 0x104   :  { %v133_v59 = vsel %vm73_vm0, %v111_v55, %v123_v57  ;;  %v132_v60 = vsel %vm73_vm0, %v109_v56, %v121_v58 }
 0x105   :  { %v150_v61 = vmul.f32 %v133_v59, %v880_v39  ;;  %v149_v62 = vmul.f32 %v132_v60, %v882_v40 }
 0x107   :  { %v125_v63 = vpop.permute.xlu1 %124  ;;  %v113_v0 = vpop.permute.xlu0 %112  ;;  %v154_v2 = vsel %vm90_vm1, %v150_v61, 0.0  ;;  %v153_v3 = vsel %vm90_vm1, %v149_v62, 0.0 }
 0x108   :  { %v134_v1 = vsel %vm73_vm0, %v113_v0, %v125_v63  ;;  %v155_v8 = vadd.f32 %v154_v2, %v153_v3  ;;  %v972_v63 = vld [vmem:[%s1137_s5] ss:$0 sm:$0xff] }
 0x109   :  { %v151_v4 = vmul.f32 %v134_v1, %v884_v41 }
 0x10b   :  { %v156_v5 = vsel %vm90_vm1, %v151_v4, 0.0  ;;  %v127_v6 = vpop.permute.xlu1 %126  ;;  %v115_v7 = vpop.permute.xlu0 %114 }
 0x10c   :  { %v135_v9 = vsel %vm73_vm0, %v115_v7, %v127_v6  ;;  %v157_v11 = vadd.f32 %v156_v5, %v155_v8 }
 0x10d   :  { %v152_v10 = vmul.f32 %v135_v9, %v878_v38 }
 0x10f   :  { %v158_v12 = vsel %vm90_vm1, %v152_v10, 0.0  ;;  %v166_v13 = vpop.permute.xlu1 %165  ;;  %v163_v14 = vpop.permute.xlu0 %162 }
 0x110   :  { %v159_v15 = vadd.f32 %v158_v12, %v157_v11  ;;  %v168_v16 = vsel %vm73_vm0, %v163_v14, %v166_v13 }
 0x111   :  { %v169_v19 = vmul.f32 %v168_v16, %v148_v54  ;;  %v180_v26 = vadd.f32 %v168_v16, %v148_v54  ;;  %v961_v54 = vld [vmem:[%s1136_s4] ss:$0 sm:$0xff] }
 0x112   :  { %v160_v17 = vmul.f32 0.25, %v159_v15 }
 0x114   :  { %v170_v18 = vmul.f32 %v160_v17, %v160_v17  ;;  %v187_v30 = vsub.f32 0.0, %v160_v17 }
 0x116   :  { %v171_v20 = vsub.f32 %v169_v19, %v170_v18 }
 0x118   :  { %771 = vrsqrt.f32 %v171_v20  ;;  %vm174_vm2 = vcmp.eq.f32.partialorder %v171_v20, inf  ;;  %v177_v23 = vand.u32 2147483648, %v171_v20  ;;  %vm176_vm3 = vcmp.eq.f32.partialorder %v171_v20, 0.0 }
 0x125   :  { %v772_v21 = vpop.eup %771 }
 0x126   :  { %v173_v22 = vmul.f32 %v772_v21, %v171_v20 }
 0x128   :  { %v175_v24 = vsel %vm174_vm2, %v171_v20, %v173_v22  ;;  %v763_v20 = vld [vmem:[%s1138_s8 + $0x38] sm:$0xff]   ;;  %v765_v22 = vld [vmem:[%s1138_s8 + $0x28] sm:$0xff]  }
 0x129   :  { %v178_v25 = vsel %vm176_vm3, %v177_v23, %v175_v24  ;;  %737 = vmatprep.subr.bf16.mxu1 %v763_v20  ;;  %v766_v23 = vld [vmem:[%s1138_s8 + $0x20] sm:$0xff]   ;;  %v767_v24 = vld [vmem:[%s1138_s8 + $0x18] sm:$0xff]  }
 0x12a   :  { %v181_v27 = vmul.f32 2.0, %v178_v25  ;;  %v185_v33 = vadd.f32 %v178_v25, %v168_v16  ;;  %738 = vmatpush3.bf16.msra.mxu1 %v763_v20  ;;  %v768_v25 = vld [vmem:[%s1138_s8 + $0x10] sm:$0xff]  }
 0x12c   :  { %v182_v28 = vadd.f32 %v181_v27, %v180_v26  ;;  %v769_v26 = vld [vmem:[%s1138_s8 + $0x8] sm:$0xff]   ;;  %v770_v27 = vld [vmem:[%s1138_s8] sm:$0xff]  }
 0x12e   :  { %773 = vrsqrt.f32 %v182_v28  ;;  %v693_v28 = vld [vmem:[%s1139_s7] ss:$0 sm:$0xff] }
 0x13b   :  { %v774_v29 = vpop.eup %773 }
 0x13c   :  { %v184_v32 = vmul.f32 %v774_v29, %v772_v21  ;;  %v764_v21 = vld [vmem:[%s1138_s8 + $0x30] sm:$0xff]  }
 0x13d   :  { %739 = vmatprep.subr.bf16.mxu1 %v764_v21 }
 0x13e   :  { %v186_v34 = vmul.f32 %v185_v33, %v184_v32  ;;  %v188_v35 = vmul.f32 %v187_v30, %v184_v32  ;;  %740 = vmatpush3.bf16.msra.mxu1 %v764_v21 }
 0x13f   :  { %741 = vmatprep.subr.bf16.mxu1 %v765_v22 }
 0x140   :  { %v190_v37 = vmul.f32 %v186_v34, %v880_v39  ;;  %v194_v42 = vmul.f32 %v188_v35, %v133_v59  ;;  %v189_v43 = vmul.f32 %v186_v34, %v882_v40  ;;  %v193_v44 = vmul.f32 %v188_v35, %v132_v60 }
 0x141   :  { %v192_v48 = vmul.f32 %v186_v34, %v878_v38  ;;  %v196_v39 = vmul.f32 %v188_v35, %v135_v9  ;;  %v191_v49 = vmul.f32 %v186_v34, %v884_v41  ;;  %v195_v40 = vmul.f32 %v188_v35, %v134_v1 }
 0x142   :  { %v198_v45 = vadd.f32 %v194_v42, %v190_v37  ;;  %v197_v46 = vadd.f32 %v193_v44, %v189_v43  ;;  %742 = vmatpush3.bf16.msra.mxu1 %v765_v22 }
 0x143   :  { %v200_v51 = vadd.f32 %v196_v39, %v192_v48  ;;  %v199_v52 = vadd.f32 %v195_v40, %v191_v49  ;;  %743 = vmatprep.subr.bf16.mxu1 %v766_v23 }
 0x144   :  { %207 = vrot.lane.b32.xlu1 %v198_v45, %s788_s16  ;;  %205 = vrot.lane.b32.xlu0 %v197_v46, %s788_s16  ;;  %v240_v59 = vmul.f32 %v956_v53, %v198_v45  ;;  %v239_v61 = vmul.f32 %v956_v53, %v197_v46 }
 0x145   :  { %v242_v11 = vmul.f32 %v956_v53, %v200_v51  ;;  %v241_v13 = vmul.f32 %v956_v53, %v199_v52 }
 0x146   :  { %744 = vmatpush3.bf16.msra.mxu1 %v766_v23 }
 0x147   :  { %745 = vmatprep.subr.bf16.mxu1 %v767_v24 }
 0x148   :  { %219 = vrot.lane.b32.xlu1 %v198_v45, %s787_s15  ;;  %217 = vrot.lane.b32.xlu0 %v197_v46, %s787_s15 }
 0x14a   :  { %746 = vmatpush3.bf16.msra.mxu1 %v767_v24 }
 0x14b   :  { %747 = vmatprep.subr.bf16.mxu1 %v768_v25 }
 0x14c   :  { %211 = vrot.lane.b32.xlu1 %v200_v51, %s788_s16  ;;  %209 = vrot.lane.b32.xlu0 %v199_v52, %s788_s16 }
 0x14e   :  { %748 = vmatpush3.bf16.msra.mxu1 %v768_v25 }
 0x14f   :  { %749 = vmatprep.subr.bf16.mxu1 %v769_v26 }
 0x150   :  { %223 = vrot.lane.b32.xlu1 %v200_v51, %s787_s15  ;;  %221 = vrot.lane.b32.xlu0 %v199_v52, %s787_s15 }
 0x152   :  { %750 = vmatpush3.bf16.msra.mxu1 %v769_v26 }
 0x153   :  { %751 = vmatprep.subr.bf16.mxu1 %v770_v27 }
 0x156   :  { %752 = vmatpush3.bf16.msra.mxu1 %v770_v27 }
 0x1b6   :  { %v208_v38 = vpop.permute.xlu1 %207  ;;  %v206_v41 = vpop.permute.xlu0 %205 }
 0x1ba   :  { %v220_v55 = vpop.permute.xlu1 %219  ;;  %v218_v56 = vpop.permute.xlu0 %217 }
 0x1bb   :  { %v230_v57 = vsel %vm73_vm0, %v208_v38, %v220_v55  ;;  %v229_v58 = vsel %vm73_vm0, %v206_v41, %v218_v56 }
 0x1bc   :  { %v250_v60 = vmul.f32 %v961_v54, %v230_v57  ;;  %v249_v62 = vmul.f32 %v961_v54, %v229_v58 }
 0x1be   :  { %v254_v0 = vadd.f32 %v250_v60, %v240_v59  ;;  %v253_v1 = vadd.f32 %v249_v62, %v239_v61  ;;  %v212_v2 = vpop.permute.xlu1 %211  ;;  %v210_v3 = vpop.permute.xlu0 %209 }
 0x1c0   :  { %v975_v4 = vadd.f32 %v972_v63, %v253_v1  ;;  %v978_v5 = vadd.f32 %v972_v63, %v254_v0 }
 0x1c2   :  { %v224_v6 = vpop.permute.xlu1 %223  ;;  %v222_v7 = vpop.permute.xlu0 %221  ;;  %v267_v8 = vpack.c.bf16 %v978_v5, %v975_v4 }
 0x1c3   :  { %v232_v9 = vsel %vm73_vm0, %v212_v2, %v224_v6  ;;  %v231_v10 = vsel %vm73_vm0, %v210_v3, %v222_v7 }
 0x1c4   :  { %v252_v12 = vmul.f32 %v961_v54, %v232_v9  ;;  %v251_v14 = vmul.f32 %v961_v54, %v231_v10  ;;  %733 = vmatprep.mubr.msk.bf16.mxu0 %vm90_vm1, %v267_v8 }
 0x1c6   :  { %v256_v15 = vadd.f32 %v252_v12, %v242_v11  ;;  %v255_v16 = vadd.f32 %v251_v14, %v241_v13 }
 0x1c8   :  { %v990_v17 = vadd.f32 %v972_v63, %v256_v15  ;;  %v993_v18 = vadd.f32 %v972_v63, %v255_v16 }
 0x1ca   :  { %v268_v19 = vpack.c.bf16 %v990_v17, %v993_v18 }
 0x1cc   :  { %734 = vmatmul.mubr.msk.bf16.vlgmr.msra.gmra.mxu0 %vm90_vm1, %v268_v19  ;;  %v700_v19 = vld [vmem:[%s1140_s9] ss:$0 sm:$0xff] }
 0x28c   :  { %v735_v29 = vpop.f32.mrf.mxu0 }
 0x28d   :  { %v357_v30 = vadd.f32 %v735_v29, %v693_v28 }
 0x28e   :  { %v348_v31 = vpop.f32.mrf.mxu0 }
 0x28f   :  { %v373_v32 = vmul.f32 0.044715, %v357_v30  ;;  %v349_v33 = vadd.f32 %v693_v28, %v348_v31  ;;  %v369_v43 = vmul.f32 0.7978846, %v357_v30  ;;  %v365_v9 = vmul.f32 0.5, %v357_v30 }
 0x290   :  { %v736_v34 = vpop.f32.mrf.mxu0 }
 0x291   :  { %v377_v35 = vmul.f32 %v373_v32, %v357_v30  ;;  %v371_v36 = vmul.f32 0.044715, %v349_v33  ;;  %v360_v37 = vadd.f32 %v736_v34, %v693_v28  ;;  %v367_v39 = vmul.f32 0.7978846, %v349_v33 }
 0x292   :  { %v351_v42 = vpop.f32.mrf.mxu0  ;;  %v363_v6 = vmul.f32 0.5, %v349_v33 }
 0x293   :  { %v381_v44 = vadd.f32 1.0, %v377_v35  ;;  %v375_v45 = vmul.f32 %v371_v36, %v349_v33  ;;  %v374_v46 = vmul.f32 0.044715, %v360_v37  ;;  %v352_v47 = vadd.f32 %v693_v28, %v351_v42 }
 0x294   :  { %v370_v51 = vmul.f32 0.7978846, %v360_v37  ;;  %v366_v2 = vmul.f32 0.5, %v360_v37 }
 0x295   :  { %v385_v48 = vmul.f32 %v381_v44, %v369_v43  ;;  %v379_v49 = vadd.f32 1.0, %v375_v45  ;;  %v378_v40 = vmul.f32 %v374_v46, %v360_v37  ;;  %v372_v50 = vmul.f32 0.044715, %v352_v47 }
 0x296   :  { %v368_v56 = vmul.f32 0.7978846, %v352_v47  ;;  %v364_v7 = vmul.f32 0.5, %v352_v47 }
 0x297   :  { %v382_v52 = vadd.f32 1.0, %v378_v40  ;;  %v383_v38 = vmul.f32 %v379_v49, %v367_v39  ;;  %v376_v41 = vmul.f32 %v372_v50, %v352_v47  ;;  %775 = vtanh.f32 %v385_v48 }
 0x299   :  { %v386_v55 = vmul.f32 %v382_v52, %v370_v51  ;;  %v380_v57 = vadd.f32 1.0, %v376_v41  ;;  %777 = vtanh.f32 %v383_v38 }
 0x29b   :  { %779 = vtanh.f32 %v386_v55  ;;  %v384_v58 = vmul.f32 %v380_v57, %v368_v56 }
 0x29d   :  { %781 = vtanh.f32 %v384_v58 }
 0x2a4   :  { %v776_v59 = vpop.eup %775 }
 0x2a5   :  { %v393_v3 = vadd.f32 1.0, %v776_v59 }
 0x2a6   :  { %v778_v60 = vpop.eup %777 }
 0x2a7   :  { %v391_v0 = vadd.f32 1.0, %v778_v60  ;;  %v397_v13 = vmul.f32 %v393_v3, %v365_v9 }
 0x2a8   :  { %v780_v61 = vpop.eup %779 }
 0x2a9   :  { %v394_v62 = vadd.f32 1.0, %v780_v61  ;;  %v395_v11 = vmul.f32 %v391_v0, %v363_v6 }
 0x2aa   :  { %v782_v1 = vpop.eup %781 }
 0x2ab   :  { %v392_v8 = vadd.f32 1.0, %v782_v1  ;;  %v398_v10 = vmul.f32 %v394_v62, %v366_v2 }
 0x2ad   :  { %v396_v12 = vmul.f32 %v392_v8, %v364_v7  ;;  %v400_v15 = vpack.c.bf16 %v398_v10, %v397_v13 }
 0x2af   :  { %v399_v14 = vpack.c.bf16 %v396_v12, %v395_v11 }
 0x2b1   :  { %753 = vmatprep.mubr.bf16.mxu1 %v399_v14 }
 0x2b2   :  { %754 = vmatmul.mubr.bf16.vlgmr.msra.gmra.mxu1 %v400_v15 }
 0x372   :  { %v755_v16 = vpop.f32.mrf.mxu1 }
 0x373   :  { %v515_v23 = vadd.f32 %v755_v16, %v700_v19 }
 0x374   :  { %v506_v20 = vpop.f32.mrf.mxu1 }
 0x375   :  { %v507_v21 = vadd.f32 %v700_v19, %v506_v20  ;;  %v523_v28 = vadd.f32 %v515_v23, %v993_v18 }
 0x376   :  { %v756_v22 = vpop.f32.mrf.mxu1 }
 0x377   :  { %v521_v25 = vadd.f32 %v507_v21, %v975_v4  ;;  %v518_v26 = vadd.f32 %v756_v22, %v700_v19  ;;  %v528_v34 = vsel %vm90_vm1, %v523_v28, 0.0 }
 0x378   :  { %v509_v24 = vpop.f32.mrf.mxu1 }
 0x379   :  { %v510_v27 = vadd.f32 %v700_v19, %v509_v24  ;;  %v525_v30 = vsel %vm90_vm1, %v521_v25, 0.0  ;;  %v524_v31 = vadd.f32 %v518_v26, %v990_v17 }
 0x37b   :  { %v522_v29 = vadd.f32 %v510_v27, %v978_v5  ;;  %v530_v36 = vsel %vm90_vm1, %v524_v31, 0.0 }
 0x37d   :  { %v526_v32 = vsel %vm90_vm1, %v522_v29, 0.0 }
 0x37e   :  { %v527_v33 = vadd.f32 %v526_v32, %v525_v30 }
 0x380   :  { %v529_v35 = vadd.f32 %v528_v34, %v527_v33 }
 0x382   :  { %v531_v37 = vadd.f32 %v530_v36, %v529_v35 }
 0x384   :  { %v532_v4 = vmul.f32 0.25, %v531_v37 }
 0x386   :  { %v1036_v42 = vsub.f32 %v522_v29, %v532_v4  ;;  %v1038_v43 = vsub.f32 %v521_v25, %v532_v4  ;;  %v1040_v18 = vsub.f32 %v523_v28, %v532_v4  ;;  %v1042_v5 = vsub.f32 %v524_v31, %v532_v4 }
 0x388   :  { %543 = vrot.lane.b32.xlu1 %v1036_v42, %s788_s16  ;;  %541 = vrot.lane.b32.xlu0 %v1038_v43, %s788_s16  ;;  %v569_v17 = vmul.f32 %v1038_v43, %v1038_v43  ;;  %v570_v44 = vmul.f32 %v1036_v42, %v1036_v42  ;;  %v571_v45 = vmul.f32 %v1040_v18, %v1040_v18 }
 0x389   :  { %v572_v46 = vmul.f32 %v1042_v5, %v1042_v5 }
 0x38a   :  { %v573_v47 = vsel %vm90_vm1, %v569_v17, 0.0  ;;  %v574_v48 = vsel %vm90_vm1, %v570_v44, 0.0  ;;  %v576_v49 = vsel %vm90_vm1, %v571_v45, 0.0 }
 0x38b   :  { %v575_v39 = vadd.f32 %v574_v48, %v573_v47  ;;  %v578_v50 = vsel %vm90_vm1, %v572_v46, 0.0 }
 0x38c   :  { %555 = vrot.lane.b32.xlu1 %v1036_v42, %s787_s15  ;;  %553 = vrot.lane.b32.xlu0 %v1038_v43, %s787_s15 }
 0x38d   :  { %v577_v40 = vadd.f32 %v576_v49, %v575_v39 }
 0x38f   :  { %v579_v51 = vadd.f32 %v578_v50, %v577_v40 }
 0x390   :  { %557 = vrot.lane.b32.xlu1 %v1040_v18, %s787_s15  ;;  %545 = vrot.lane.b32.xlu0 %v1040_v18, %s788_s16 }
 0x391   :  { %v580_v52 = vmul.f32 0.25, %v579_v51 }
 0x393   :  { %v581_v38 = vadd.f32 1e-05, %v580_v52 }
 0x394   :  { %559 = vrot.lane.b32.xlu1 %v1042_v5, %s787_s15  ;;  %547 = vrot.lane.b32.xlu0 %v1042_v5, %s788_s16 }
 0x398   :  { %598 = vrot.lane.b32.xlu1 %v581_v38, %s787_s15  ;;  %595 = vrot.lane.b32.xlu0 %v581_v38, %s788_s16 }
 0x3fa   :  { %v544_v41 = vpop.permute.xlu1 %543  ;;  %v542_v55 = vpop.permute.xlu0 %541 }
 0x3fe   :  { %v556_v56 = vpop.permute.xlu1 %555  ;;  %v554_v57 = vpop.permute.xlu0 %553 }
 0x3ff   :  { %v566_v58 = vsel %vm73_vm0, %v544_v41, %v556_v56  ;;  %v565_v59 = vsel %vm73_vm0, %v542_v55, %v554_v57 }
 0x400   :  { %v583_v60 = vmul.f32 %v566_v58, %v1036_v42  ;;  %v582_v61 = vmul.f32 %v565_v59, %v1038_v43 }
 0x402   :  { %v558_v62 = vpop.permute.xlu1 %557  ;;  %v546_v0 = vpop.permute.xlu0 %545  ;;  %v587_v2 = vsel %vm90_vm1, %v583_v60, 0.0  ;;  %v586_v3 = vsel %vm90_vm1, %v582_v61, 0.0 }
 0x403   :  { %v567_v1 = vsel %vm73_vm0, %v546_v0, %v558_v62  ;;  %v588_v10 = vadd.f32 %v587_v2, %v586_v3 }
 0x404   :  { %v584_v6 = vmul.f32 %v567_v1, %v1040_v18 }
 0x406   :  { %v589_v7 = vsel %vm90_vm1, %v584_v6, 0.0  ;;  %v560_v8 = vpop.permute.xlu1 %559  ;;  %v548_v9 = vpop.permute.xlu0 %547 }
 0x407   :  { %v568_v11 = vsel %vm73_vm0, %v548_v9, %v560_v8  ;;  %v590_v13 = vadd.f32 %v589_v7, %v588_v10 }
 0x408   :  { %v585_v12 = vmul.f32 %v568_v11, %v1042_v5 }
 0x40a   :  { %v591_v14 = vsel %vm90_vm1, %v585_v12, 0.0  ;;  %v599_v15 = vpop.permute.xlu1 %598  ;;  %v596_v16 = vpop.permute.xlu0 %595 }
 0x40b   :  { %v592_v19 = vadd.f32 %v591_v14, %v590_v13  ;;  %v601_v20 = vsel %vm73_vm0, %v596_v16, %v599_v15 }
 0x40c   :  { %v602_v23 = vmul.f32 %v601_v20, %v581_v38  ;;  %v613_v30 = vadd.f32 %v601_v20, %v581_v38 }
 0x40d   :  { %v593_v21 = vmul.f32 0.25, %v592_v19 }
 0x40f   :  { %v603_v22 = vmul.f32 %v593_v21, %v593_v21  ;;  %v620_v34 = vsub.f32 0.0, %v593_v21 }
 0x411   :  { %v604_v24 = vsub.f32 %v602_v23, %v603_v22 }
 0x413   :  { %783 = vrsqrt.f32 %v604_v24  ;;  %vm607_vm4 = vcmp.eq.f32.partialorder %v604_v24, inf  ;;  %v610_v27 = vand.u32 2147483648, %v604_v24  ;;  %vm609_vm5 = vcmp.eq.f32.partialorder %v604_v24, 0.0 }
 0x420   :  { %v784_v25 = vpop.eup %783 }
 0x421   :  { %v606_v26 = vmul.f32 %v784_v25, %v604_v24 }
 0x423   :  { %v608_v28 = vsel %vm607_vm4, %v604_v24, %v606_v26 }
 0x424   :  { %v611_v29 = vsel %vm609_vm5, %v610_v27, %v608_v28 }
 0x425   :  { %v614_v31 = vmul.f32 2.0, %v611_v29  ;;  %v618_v36 = vadd.f32 %v611_v29, %v601_v20 }
 0x427   :  { %v615_v32 = vadd.f32 %v614_v31, %v613_v30 }
 0x429   :  { %785 = vrsqrt.f32 %v615_v32 }
 0x436   :  { %v786_v33 = vpop.eup %785 }
 0x437   :  { %v617_v35 = vmul.f32 %v786_v33, %v784_v25 }
 0x439   :  { %v619_v37 = vmul.f32 %v618_v36, %v617_v35  ;;  %v621_v4 = vmul.f32 %v620_v34, %v617_v35 }
 0x43b   :  { %v623_v17 = vmul.f32 %v619_v37, %v1036_v42  ;;  %v627_v44 = vmul.f32 %v621_v4, %v566_v58  ;;  %v622_v45 = vmul.f32 %v619_v37, %v1038_v43  ;;  %v626_v46 = vmul.f32 %v621_v4, %v565_v59 }
 0x43c   :  { %v625_v47 = vmul.f32 %v619_v37, %v1042_v5  ;;  %v629_v48 = vmul.f32 %v621_v4, %v568_v11  ;;  %v624_v40 = vmul.f32 %v619_v37, %v1040_v18  ;;  %v628_v50 = vmul.f32 %v621_v4, %v567_v1 }
 0x43d   :  { %v631_v39 = vadd.f32 %v627_v44, %v623_v17  ;;  %v630_v49 = vadd.f32 %v626_v46, %v622_v45 }
 0x43e   :  { %v633_v51 = vadd.f32 %v629_v48, %v625_v47  ;;  %v632_v52 = vadd.f32 %v628_v50, %v624_v40 }
 0x43f   :  { %640 = vrot.lane.b32.xlu1 %v631_v39, %s788_s16  ;;  %638 = vrot.lane.b32.xlu0 %v630_v49, %s788_s16  ;;  %v667_v57 = vmul.f32 %v956_v53, %v631_v39  ;;  %v666_v59 = vmul.f32 %v956_v53, %v630_v49 }
 0x440   :  { %v669_v2 = vmul.f32 %v956_v53, %v633_v51  ;;  %v668_v6 = vmul.f32 %v956_v53, %v632_v52 }
 0x443   :  { %644 = vrot.lane.b32.xlu1 %v633_v51, %s788_s16  ;;  %642 = vrot.lane.b32.xlu0 %v632_v52, %s788_s16 }
 0x447   :  { %652 = vrot.lane.b32.xlu1 %v631_v39, %s787_s15  ;;  %650 = vrot.lane.b32.xlu0 %v630_v49, %s787_s15 }
 0x44b   :  { %656 = vrot.lane.b32.xlu1 %v633_v51, %s787_s15  ;;  %654 = vrot.lane.b32.xlu0 %v632_v52, %s787_s15 }
 0x4b1   :  { %v641_v42 = vpop.permute.xlu1 %640  ;;  %v639_v43 = vpop.permute.xlu0 %638 }
 0x4b5   :  { %v645_v18 = vpop.permute.xlu1 %644  ;;  %v643_v5 = vpop.permute.xlu0 %642 }
 0x4b9   :  { %v653_v38 = vpop.permute.xlu1 %652  ;;  %v651_v41 = vpop.permute.xlu0 %650 }
 0x4ba   :  { %v663_v55 = vsel %vm73_vm0, %v641_v42, %v653_v38  ;;  %v662_v56 = vsel %vm73_vm0, %v639_v43, %v651_v41 }
 0x4bb   :  { %v671_v58 = vmul.f32 %v961_v54, %v663_v55  ;;  %v670_v60 = vmul.f32 %v961_v54, %v662_v56 }
 0x4bd   :  { %v675_v61 = vadd.f32 %v671_v58, %v667_v57  ;;  %v674_v62 = vadd.f32 %v670_v60, %v666_v59  ;;  %v657_v0 = vpop.permute.xlu1 %656  ;;  %v655_v1 = vpop.permute.xlu0 %654 }
 0x4be   :  { %v665_v3 = vsel %vm73_vm0, %v645_v18, %v657_v0  ;;  %v664_v7 = vsel %vm73_vm0, %v643_v5, %v655_v1 }
 0x4bf   :  { %v679_v8 = vadd.f32 %v972_v63, %v675_v61  ;;  %v678_v9 = vadd.f32 %v972_v63, %v674_v62  ;;  %v673_v10 = vmul.f32 %v961_v54, %v665_v3  ;;  %v672_v11 = vmul.f32 %v961_v54, %v664_v7 }
 0x4c1   :  { %683 = vst.msk [vmem:[%s1141_s10 + $0x8] sm:$0xff] %vm90_vm1, %v679_v8  ;;  %682 = vst.msk [vmem:[%s1141_s10] sm:$0xff] %vm90_vm1, %v678_v9  ;;  %v677_v53 = vadd.f32 %v673_v10, %v669_v2  ;;  %v676_v12 = vadd.f32 %v672_v11, %v668_v6 }
 0x4c3   :  { %v681_v13 = vadd.f32 %v972_v63, %v677_v53  ;;  %v680_v14 = vadd.f32 %v972_v63, %v676_v12 }
 0x4c5   :  { %685 = vst.msk [vmem:[%s1141_s10 + $0x18] sm:$0xff] %vm90_vm1, %v681_v13  ;;  %684 = vst.msk [vmem:[%s1141_s10 + $0x10] sm:$0xff] %vm90_vm1, %v680_v14 }

// kernel: _encoder_impl.1
= control target key start
LH: loop header
LB: loop body
LE: loop exit
PB: predicated region body
PF: predicated region fallthrough
CT: control target
= control target key end

     0   :  { %s787_s15 = smov 32   ;;  %s788_s16 = smov 96   ;;  %vm73_vm0 = vcmask 261120   ;;  %vm90_vm1 = vcmask 523264   ;;  %s1131_s0 = inlined_call_operand.vmem [shape: f32[4,8,64], index: 0, kind: input, shape index: {}]   ;;  %s1132_s1 = inlined_call_operand.vmem [shape: f32[8,64], index: 1, kind: input, shape index: {}]   ;;  %s1133_s2 = inlined_call_operand.vmem [shape: f32[8,64], index: 2, kind: input, shape index: {}]   ;;  %s1134_s6 = inlined_call_operand.vmem [shape: bf16[64,128], index: 6, kind: input, shape index: {}]   ;;  %s1135_s3 = inlined_call_operand.vmem [shape: f32[1,64], index: 3, kind: input, shape index: {}]   ;;  %s1136_s4 = inlined_call_operand.vmem [shape: f32[1,64], index: 4, kind: input, shape index: {}]   ;;  %s1137_s5 = inlined_call_operand.vmem [shape: f32[1,64], index: 5, kind: input, shape index: {}]   ;;  %s1138_s8 = inlined_call_operand.vmem [shape: bf16[128,64], index: 8, kind: input, shape index: {}]   ;;  %s1139_s7 = inlined_call_operand.vmem [shape: f32[1,128], index: 7, kind: input, shape index: {}]   ;;  %s1140_s9 = inlined_call_operand.vmem [shape: f32[1,64], index: 9, kind: input, shape index: {}]   ;;  %s1141_s10 = inlined_call_operand.vmem [shape: f32[4,8,64], index: 10, kind: output, shape index: {}]  }
   0x1   :  { %v36_v0 = vld [vmem:[%s1131_s0] sm:$0xff]  ;;  %v37_v1 = vld [vmem:[%s1131_s0 + $0x8] sm:$0xff]  ;;  %v38_v2 = vld [vmem:[%s1131_s0 + $0x10] sm:$0xff] }
   0x2   :  { %61 = vrot.lane.b32.xlu1 %v36_v0, %s787_s15  ;;  %49 = vrot.lane.b32.xlu0 %v36_v0, %s788_s16  ;;  %v39_v3 = vld [vmem:[%s1131_s0 + $0x18] sm:$0xff]  ;;  %v40_v4 = vld [vmem:[%s1132_s1] sm:$0xff] }
   0x3   :  { %v78_v5 = vld [vmem:[%s1133_s2] sm:$0xff]  ;;  %v41_v9 = vmul.f32 %v40_v4, %v36_v0  ;;  %v42_v11 = vmul.f32 %v40_v4, %v37_v1  ;;  %v43_v17 = vmul.f32 %v40_v4, %v38_v2  ;;  %v44_v26 = vmul.f32 %v40_v4, %v39_v3 }
   0x6   :  { %63 = vrot.lane.b32.xlu1 %v37_v1, %s787_s15  ;;  %51 = vrot.lane.b32.xlu0 %v37_v1, %s788_s16 }
   0xa   :  { %65 = vrot.lane.b32.xlu1 %v38_v2, %s787_s15  ;;  %53 = vrot.lane.b32.xlu0 %v38_v2, %s788_s16 }
   0xe   :  { %67 = vrot.lane.b32.xlu1 %v39_v3, %s787_s15  ;;  %55 = vrot.lane.b32.xlu0 %v39_v3, %s788_s16 }
  0x74   :  { %v62_v6 = vpop.permute.xlu1 %61  ;;  %v50_v7 = vpop.permute.xlu0 %49 }
  0x75   :  { %v74_v8 = vsel %vm73_vm0, %v50_v7, %v62_v6 }
  0x76   :  { %v79_v10 = vmul.f32 %v78_v5, %v74_v8 }
  0x78   :  { %v64_v12 = vpop.permute.xlu1 %63  ;;  %v52_v13 = vpop.permute.xlu0 %51  ;;  %v83_v15 = vadd.f32 %v79_v10, %v41_v9 }
  0x79   :  { %v75_v14 = vsel %vm73_vm0, %v52_v13, %v64_v12 }
  0x7a   :  { %v80_v16 = vmul.f32 %v78_v5, %v75_v14  ;;  %v91_v22 = vsel %vm90_vm1, %v83_v15, 0.0 }
  0x7c   :  { %v84_v18 = vadd.f32 %v80_v16, %v42_v11  ;;  %v66_v19 = vpop.permute.xlu1 %65  ;;  %v54_v20 = vpop.permute.xlu0 %53 }
  0x7d   :  { %v76_v21 = vsel %vm73_vm0, %v54_v20, %v66_v19 }
  0x7e   :  { %v92_v23 = vsel %vm90_vm1, %v84_v18, 0.0  ;;  %v81_v24 = vmul.f32 %v78_v5, %v76_v21 }
  0x7f   :  { %v93_v25 = vadd.f32 %v92_v23, %v91_v22 }
  0x80   :  { %v85_v27 = vadd.f32 %v81_v24, %v43_v17  ;;  %v68_v28 = vpop.permute.xlu1 %67  ;;  %v56_v29 = vpop.permute.xlu0 %55 }
  0x81   :  { %v77_v30 = vsel %vm73_vm0, %v56_v29, %v68_v28 }
  0x82   :  { %v94_v31 = vsel %vm90_vm1, %v85_v27, 0.0  ;;  %v82_v32 = vmul.f32 %v78_v5, %v77_v30 }
  0x83   :  { %v95_v33 = vadd.f32 %v94_v31, %v93_v25  ;;  %v759_v31 = vld [vmem:[%s1134_s6 + $0x18] sm:$0xff]  }
  0x84   :  { %v86_v34 = vadd.f32 %v82_v32, %v44_v26  ;;  %725 = vmatprep.subr.bf16.mxu0 %v759_v31 }
  0x85   :  { %726 = vmatpush3.bf16.msra.mxu0 %v759_v31 }
  0x86   :  { %v96_v35 = vsel %vm90_vm1, %v86_v34, 0.0 }
  0x87   :  { %v97_v36 = vadd.f32 %v96_v35, %v95_v33 }
  0x89   :  { %v99_v37 = vmul.f32 0.25, %v97_v36  ;;  %v760_v36 = vld [vmem:[%s1134_s6 + $0x10] sm:$0xff]  }
  0x8a   :  { %727 = vmatprep.subr.bf16.mxu0 %v760_v36 }
  0x8b   :  { %v878_v38 = vsub.f32 %v86_v34, %v99_v37  ;;  %v880_v39 = vsub.f32 %v84_v18, %v99_v37  ;;  %v882_v40 = vsub.f32 %v83_v15, %v99_v37  ;;  %v884_v41 = vsub.f32 %v85_v27, %v99_v37  ;;  %728 = vmatpush3.bf16.msra.mxu0 %v760_v36 }
  0x8d   :  { %110 = vrot.lane.b32.xlu1 %v880_v39, %s788_s16  ;;  %108 = vrot.lane.b32.xlu0 %v882_v40, %s788_s16  ;;  %v136_v42 = vmul.f32 %v882_v40, %v882_v40  ;;  %v137_v43 = vmul.f32 %v880_v39, %v880_v39  ;;  %v138_v44 = vmul.f32 %v884_v41, %v884_v41 }
  0x8e   :  { %v139_v45 = vmul.f32 %v878_v38, %v878_v38 }
  0x8f   :  { %v140_v46 = vsel %vm90_vm1, %v136_v42, 0.0  ;;  %v141_v47 = vsel %vm90_vm1, %v137_v43, 0.0  ;;  %v143_v49 = vsel %vm90_vm1, %v138_v44, 0.0 }
  0x90   :  { %v142_v48 = vadd.f32 %v141_v47, %v140_v46  ;;  %v145_v51 = vsel %vm90_vm1, %v139_v45, 0.0  ;;  %v761_v47 = vld [vmem:[%s1134_s6 + $0x8] sm:$0xff]  }
  0x91   :  { %122 = vrot.lane.b32.xlu1 %v880_v39, %s787_s15  ;;  %120 = vrot.lane.b32.xlu0 %v882_v40, %s787_s15 }
  0x92   :  { %v144_v50 = vadd.f32 %v143_v49, %v142_v48  ;;  %729 = vmatprep.subr.bf16.mxu0 %v761_v47 }
  0x93   :  { %730 = vmatpush3.bf16.msra.mxu0 %v761_v47 }
  0x94   :  { %v146_v52 = vadd.f32 %v145_v51, %v144_v50  ;;  %v762_v50 = vld [vmem:[%s1134_s6] sm:$0xff]  }
  0x95   :  { %124 = vrot.lane.b32.xlu1 %v884_v41, %s787_s15  ;;  %112 = vrot.lane.b32.xlu0 %v884_v41, %s788_s16 }
  0x96   :  { %v147_v53 = vmul.f32 0.25, %v146_v52  ;;  %731 = vmatprep.subr.bf16.mxu0 %v762_v50 }
  0x97   :  { %732 = vmatpush3.bf16.msra.mxu0 %v762_v50 }
  0x98   :  { %v148_v54 = vadd.f32 1e-05, %v147_v53  ;;  %v956_v53 = vld [vmem:[%s1135_s3] ss:$0 sm:$0xff] }
  0x99   :  { %126 = vrot.lane.b32.xlu1 %v878_v38, %s787_s15  ;;  %114 = vrot.lane.b32.xlu0 %v878_v38, %s788_s16 }
  0x9d   :  { %165 = vrot.lane.b32.xlu1 %v148_v54, %s787_s15  ;;  %162 = vrot.lane.b32.xlu0 %v148_v54, %s788_s16 }
  0xff   :  { %v111_v55 = vpop.permute.xlu1 %110  ;;  %v109_v56 = vpop.permute.xlu0 %108 }
 0x103   :  { %v123_v57 = vpop.permute.xlu1 %122  ;;  %v121_v58 = vpop.permute.xlu0 %120 }
 0x104   :  { %v133_v59 = vsel %vm73_vm0, %v111_v55, %v123_v57  ;;  %v132_v60 = vsel %vm73_vm0, %v109_v56, %v121_v58 }
 0x105   :  { %v150_v61 = vmul.f32 %v133_v59, %v880_v39  ;;  %v149_v62 = vmul.f32 %v132_v60, %v882_v40 }
 0x107   :  { %v125_v63 = vpop.permute.xlu1 %124  ;;  %v113_v0 = vpop.permute.xlu0 %112  ;;  %v154_v2 = vsel %vm90_vm1, %v150_v61, 0.0  ;;  %v153_v3 = vsel %vm90_vm1, %v149_v62, 0.0 }
 0x108   :  { %v134_v1 = vsel %vm73_vm0, %v113_v0, %v125_v63  ;;  %v155_v8 = vadd.f32 %v154_v2, %v153_v3  ;;  %v972_v63 = vld [vmem:[%s1137_s5] ss:$0 sm:$0xff] }
 0x109   :  { %v151_v4 = vmul.f32 %v134_v1, %v884_v41 }
 0x10b   :  { %v156_v5 = vsel %vm90_vm1, %v151_v4, 0.0  ;;  %v127_v6 = vpop.permute.xlu1 %126  ;;  %v115_v7 = vpop.permute.xlu0 %114 }
 0x10c   :  { %v135_v9 = vsel %vm73_vm0, %v115_v7, %v127_v6  ;;  %v157_v11 = vadd.f32 %v156_v5, %v155_v8 }
 0x10d   :  { %v152_v10 = vmul.f32 %v135_v9, %v878_v38 }
 0x10f   :  { %v158_v12 = vsel %vm90_vm1, %v152_v10, 0.0  ;;  %v166_v13 = vpop.permute.xlu1 %165  ;;  %v163_v14 = vpop.permute.xlu0 %162 }
 0x110   :  { %v159_v15 = vadd.f32 %v158_v12, %v157_v11  ;;  %v168_v16 = vsel %vm73_vm0, %v163_v14, %v166_v13 }
 0x111   :  { %v169_v19 = vmul.f32 %v168_v16, %v148_v54  ;;  %v180_v26 = vadd.f32 %v168_v16, %v148_v54  ;;  %v961_v54 = vld [vmem:[%s1136_s4] ss:$0 sm:$0xff] }
 0x112   :  { %v160_v17 = vmul.f32 0.25, %v159_v15 }
 0x114   :  { %v170_v18 = vmul.f32 %v160_v17, %v160_v17  ;;  %v187_v30 = vsub.f32 0.0, %v160_v17 }
 0x116   :  { %v171_v20 = vsub.f32 %v169_v19, %v170_v18 }
 0x118   :  { %771 = vrsqrt.f32 %v171_v20  ;;  %vm174_vm2 = vcmp.eq.f32.partialorder %v171_v20, inf  ;;  %v177_v23 = vand.u32 2147483648, %v171_v20  ;;  %vm176_vm3 = vcmp.eq.f32.partialorder %v171_v20, 0.0 }
 0x125   :  { %v772_v21 = vpop.eup %771 }
 0x126   :  { %v173_v22 = vmul.f32 %v772_v21, %v171_v20 }
 0x128   :  { %v175_v24 = vsel %vm174_vm2, %v171_v20, %v173_v22  ;;  %v763_v20 = vld [vmem:[%s1138_s8 + $0x38] sm:$0xff]   ;;  %v765_v22 = vld [vmem:[%s1138_s8 + $0x28] sm:$0xff]  }
 0x129   :  { %v178_v25 = vsel %vm176_vm3, %v177_v23, %v175_v24  ;;  %737 = vmatprep.subr.bf16.mxu1 %v763_v20  ;;  %v766_v23 = vld [vmem:[%s1138_s8 + $0x20] sm:$0xff]   ;;  %v767_v24 = vld [vmem:[%s1138_s8 + $0x18] sm:$0xff]  }
 0x12a   :  { %v181_v27 = vmul.f32 2.0, %v178_v25  ;;  %v185_v33 = vadd.f32 %v178_v25, %v168_v16  ;;  %738 = vmatpush3.bf16.msra.mxu1 %v763_v20  ;;  %v768_v25 = vld [vmem:[%s1138_s8 + $0x10] sm:$0xff]  }
 0x12c   :  { %v182_v28 = vadd.f32 %v181_v27, %v180_v26  ;;  %v769_v26 = vld [vmem:[%s1138_s8 + $0x8] sm:$0xff]   ;;  %v770_v27 = vld [vmem:[%s1138_s8] sm:$0xff]  }
 0x12e   :  { %773 = vrsqrt.f32 %v182_v28  ;;  %v693_v28 = vld [vmem:[%s1139_s7] ss:$0 sm:$0xff] }
 0x13b   :  { %v774_v29 = vpop.eup %773 }
 0x13c   :  { %v184_v32 = vmul.f32 %v774_v29, %v772_v21  ;;  %v764_v21 = vld [vmem:[%s1138_s8 + $0x30] sm:$0xff]  }
 0x13d   :  { %739 = vmatprep.subr.bf16.mxu1 %v764_v21 }
 0x13e   :  { %v186_v34 = vmul.f32 %v185_v33, %v184_v32  ;;  %v188_v35 = vmul.f32 %v187_v30, %v184_v32  ;;  %740 = vmatpush3.bf16.msra.mxu1 %v764_v21 }
 0x13f   :  { %741 = vmatprep.subr.bf16.mxu1 %v765_v22 }
 0x140   :  { %v190_v37 = vmul.f32 %v186_v34, %v880_v39  ;;  %v194_v42 = vmul.f32 %v188_v35, %v133_v59  ;;  %v189_v43 = vmul.f32 %v186_v34, %v882_v40  ;;  %v193_v44 = vmul.f32 %v188_v35, %v132_v60 }
 0x141   :  { %v192_v48 = vmul.f32 %v186_v34, %v878_v38  ;;  %v196_v39 = vmul.f32 %v188_v35, %v135_v9  ;;  %v191_v49 = vmul.f32 %v186_v34, %v884_v41  ;;  %v195_v40 = vmul.f32 %v188_v35, %v134_v1 }
 0x142   :  { %v198_v45 = vadd.f32 %v194_v42, %v190_v37  ;;  %v197_v46 = vadd.f32 %v193_v44, %v189_v43  ;;  %742 = vmatpush3.bf16.msra.mxu1 %v765_v22 }
 0x143   :  { %v200_v51 = vadd.f32 %v196_v39, %v192_v48  ;;  %v199_v52 = vadd.f32 %v195_v40, %v191_v49  ;;  %743 = vmatprep.subr.bf16.mxu1 %v766_v23 }
 0x144   :  { %207 = vrot.lane.b32.xlu1 %v198_v45, %s788_s16  ;;  %205 = vrot.lane.b32.xlu0 %v197_v46, %s788_s16  ;;  %v240_v59 = vmul.f32 %v956_v53, %v198_v45  ;;  %v239_v61 = vmul.f32 %v956_v53, %v197_v46 }
 0x145   :  { %v242_v11 = vmul.f32 %v956_v53, %v200_v51  ;;  %v241_v13 = vmul.f32 %v956_v53, %v199_v52 }
 0x146   :  { %744 = vmatpush3.bf16.msra.mxu1 %v766_v23 }
 0x147   :  { %745 = vmatprep.subr.bf16.mxu1 %v767_v24 }
 0x148   :  { %219 = vrot.lane.b32.xlu1 %v198_v45, %s787_s15  ;;  %217 = vrot.lane.b32.xlu0 %v197_v46, %s787_s15 }
 0x14a   :  { %746 = vmatpush3.bf16.msra.mxu1 %v767_v24 }
 0x14b   :  { %747 = vmatprep.subr.bf16.mxu1 %v768_v25 }
 0x14c   :  { %211 = vrot.lane.b32.xlu1 %v200_v51, %s788_s16  ;;  %209 = vrot.lane.b32.xlu0 %v199_v52, %s788_s16 }
 0x14e   :  { %748 = vmatpush3.bf16.msra.mxu1 %v768_v25 }
 0x14f   :  { %749 = vmatprep.subr.bf16.mxu1 %v769_v26 }
 0x150   :  { %223 = vrot.lane.b32.xlu1 %v200_v51, %s787_s15  ;;  %221 = vrot.lane.b32.xlu0 %v199_v52, %s787_s15 }
 0x152   :  { %750 = vmatpush3.bf16.msra.mxu1 %v769_v26 }
 0x153   :  { %751 = vmatprep.subr.bf16.mxu1 %v770_v27 }
 0x156   :  { %752 = vmatpush3.bf16.msra.mxu1 %v770_v27 }
 0x1b6   :  { %v208_v38 = vpop.permute.xlu1 %207  ;;  %v206_v41 = vpop.permute.xlu0 %205 }
 0x1ba   :  { %v220_v55 = vpop.permute.xlu1 %219  ;;  %v218_v56 = vpop.permute.xlu0 %217 }
 0x1bb   :  { %v230_v57 = vsel %vm73_vm0, %v208_v38, %v220_v55  ;;  %v229_v58 = vsel %vm73_vm0, %v206_v41, %v218_v56 }
 0x1bc   :  { %v250_v60 = vmul.f32 %v961_v54, %v230_v57  ;;  %v249_v62 = vmul.f32 %v961_v54, %v229_v58 }
 0x1be   :  { %v254_v0 = vadd.f32 %v250_v60, %v240_v59  ;;  %v253_v1 = vadd.f32 %v249_v62, %v239_v61  ;;  %v212_v2 = vpop.permute.xlu1 %211  ;;  %v210_v3 = vpop.permute.xlu0 %209 }
 0x1c0   :  { %v975_v4 = vadd.f32 %v972_v63, %v253_v1  ;;  %v978_v5 = vadd.f32 %v972_v63, %v254_v0 }
 0x1c2   :  { %v224_v6 = vpop.permute.xlu1 %223  ;;  %v222_v7 = vpop.permute.xlu0 %221  ;;  %v267_v8 = vpack.c.bf16 %v978_v5, %v975_v4 }
 0x1c3   :  { %v232_v9 = vsel %vm73_vm0, %v212_v2, %v224_v6  ;;  %v231_v10 = vsel %vm73_vm0, %v210_v3, %v222_v7 }
 0x1c4   :  { %v252_v12 = vmul.f32 %v961_v54, %v232_v9  ;;  %v251_v14 = vmul.f32 %v961_v54, %v231_v10  ;;  %733 = vmatprep.mubr.msk.bf16.mxu0 %vm90_vm1, %v267_v8 }
 0x1c6   :  { %v256_v15 = vadd.f32 %v252_v12, %v242_v11  ;;  %v255_v16 = vadd.f32 %v251_v14, %v241_v13 }
 0x1c8   :  { %v990_v17 = vadd.f32 %v972_v63, %v256_v15  ;;  %v993_v18 = vadd.f32 %v972_v63, %v255_v16 }
 0x1ca   :  { %v268_v19 = vpack.c.bf16 %v990_v17, %v993_v18 }
 0x1cc   :  { %734 = vmatmul.mubr.msk.bf16.vlgmr.msra.gmra.mxu0 %vm90_vm1, %v268_v19  ;;  %v700_v19 = vld [vmem:[%s1140_s9] ss:$0 sm:$0xff] }
 0x28c   :  { %v735_v29 = vpop.f32.mrf.mxu0 }
 0x28d   :  { %v357_v30 = vadd.f32 %v735_v29, %v693_v28 }
 0x28e   :  { %v348_v31 = vpop.f32.mrf.mxu0 }
 0x28f   :  { %v373_v32 = vmul.f32 0.044715, %v357_v30  ;;  %v349_v33 = vadd.f32 %v693_v28, %v348_v31  ;;  %v369_v43 = vmul.f32 0.7978846, %v357_v30  ;;  %v365_v9 = vmul.f32 0.5, %v357_v30 }
 0x290   :  { %v736_v34 = vpop.f32.mrf.mxu0 }
 0x291   :  { %v377_v35 = vmul.f32 %v373_v32, %v357_v30  ;;  %v371_v36 = vmul.f32 0.044715, %v349_v33  ;;  %v360_v37 = vadd.f32 %v736_v34, %v693_v28  ;;  %v367_v39 = vmul.f32 0.7978846, %v349_v33 }
 0x292   :  { %v351_v42 = vpop.f32.mrf.mxu0  ;;  %v363_v6 = vmul.f32 0.5, %v349_v33 }
 0x293   :  { %v381_v44 = vadd.f32 1.0, %v377_v35  ;;  %v375_v45 = vmul.f32 %v371_v36, %v349_v33  ;;  %v374_v46 = vmul.f32 0.044715, %v360_v37  ;;  %v352_v47 = vadd.f32 %v693_v28, %v351_v42 }
 0x294   :  { %v370_v51 = vmul.f32 0.7978846, %v360_v37  ;;  %v366_v2 = vmul.f32 0.5, %v360_v37 }
 0x295   :  { %v385_v48 = vmul.f32 %v381_v44, %v369_v43  ;;  %v379_v49 = vadd.f32 1.0, %v375_v45  ;;  %v378_v40 = vmul.f32 %v374_v46, %v360_v37  ;;  %v372_v50 = vmul.f32 0.044715, %v352_v47 }
 0x296   :  { %v368_v56 = vmul.f32 0.7978846, %v352_v47  ;;  %v364_v7 = vmul.f32 0.5, %v352_v47 }
 0x297   :  { %v382_v52 = vadd.f32 1.0, %v378_v40  ;;  %v383_v38 = vmul.f32 %v379_v49, %v367_v39  ;;  %v376_v41 = vmul.f32 %v372_v50, %v352_v47  ;;  %775 = vtanh.f32 %v385_v48 }
 0x299   :  { %v386_v55 = vmul.f32 %v382_v52, %v370_v51  ;;  %v380_v57 = vadd.f32 1.0, %v376_v41  ;;  %777 = vtanh.f32 %v383_v38 }
 0x29b   :  { %779 = vtanh.f32 %v386_v55  ;;  %v384_v58 = vmul.f32 %v380_v57, %v368_v56 }
 0x29d   :  { %781 = vtanh.f32 %v384_v58 }
 0x2a4   :  { %v776_v59 = vpop.eup %775 }
 0x2a5   :  { %v393_v3 = vadd.f32 1.0, %v776_v59 }
 0x2a6   :  { %v778_v60 = vpop.eup %777 }
 0x2a7   :  { %v391_v0 = vadd.f32 1.0, %v778_v60  ;;  %v397_v13 = vmul.f32 %v393_v3, %v365_v9 }
 0x2a8   :  { %v780_v61 = vpop.eup %779 }
 0x2a9   :  { %v394_v62 = vadd.f32 1.0, %v780_v61  ;;  %v395_v11 = vmul.f32 %v391_v0, %v363_v6 }
 0x2aa   :  { %v782_v1 = vpop.eup %781 }
 0x2ab   :  { %v392_v8 = vadd.f32 1.0, %v782_v1  ;;  %v398_v10 = vmul.f32 %v394_v62, %v366_v2 }
 0x2ad   :  { %v396_v12 = vmul.f32 %v392_v8, %v364_v7  ;;  %v400_v15 = vpack.c.bf16 %v398_v10, %v397_v13 }
 0x2af   :  { %v399_v14 = vpack.c.bf16 %v396_v12, %v395_v11 }
 0x2b1   :  { %753 = vmatprep.mubr.bf16.mxu1 %v399_v14 }
 0x2b2   :  { %754 = vmatmul.mubr.bf16.vlgmr.msra.gmra.mxu1 %v400_v15 }
 0x372   :  { %v755_v16 = vpop.f32.mrf.mxu1 }
 0x373   :  { %v515_v23 = vadd.f32 %v755_v16, %v700_v19 }
 0x374   :  { %v506_v20 = vpop.f32.mrf.mxu1 }
 0x375   :  { %v507_v21 = vadd.f32 %v700_v19, %v506_v20  ;;  %v523_v28 = vadd.f32 %v515_v23, %v993_v18 }
 0x376   :  { %v756_v22 = vpop.f32.mrf.mxu1 }
 0x377   :  { %v521_v25 = vadd.f32 %v507_v21, %v975_v4  ;;  %v518_v26 = vadd.f32 %v756_v22, %v700_v19  ;;  %v528_v34 = vsel %vm90_vm1, %v523_v28, 0.0 }
 0x378   :  { %v509_v24 = vpop.f32.mrf.mxu1 }
 0x379   :  { %v510_v27 = vadd.f32 %v700_v19, %v509_v24  ;;  %v525_v30 = vsel %vm90_vm1, %v521_v25, 0.0  ;;  %v524_v31 = vadd.f32 %v518_v26, %v990_v17 }
 0x37b   :  { %v522_v29 = vadd.f32 %v510_v27, %v978_v5  ;;  %v530_v36 = vsel %vm90_vm1, %v524_v31, 0.0 }
 0x37d   :  { %v526_v32 = vsel %vm90_vm1, %v522_v29, 0.0 }
 0x37e   :  { %v527_v33 = vadd.f32 %v526_v32, %v525_v30 }
 0x380   :  { %v529_v35 = vadd.f32 %v528_v34, %v527_v33 }
 0x382   :  { %v531_v37 = vadd.f32 %v530_v36, %v529_v35 }
 0x384   :  { %v532_v4 = vmul.f32 0.25, %v531_v37 }
 0x386   :  { %v1036_v42 = vsub.f32 %v522_v29, %v532_v4  ;;  %v1038_v43 = vsub.f32 %v521_v25, %v532_v4  ;;  %v1040_v18 = vsub.f32 %v523_v28, %v532_v4  ;;  %v1042_v5 = vsub.f32 %v524_v31, %v532_v4 }
 0x388   :  { %543 = vrot.lane.b32.xlu1 %v1036_v42, %s788_s16  ;;  %541 = vrot.lane.b32.xlu0 %v1038_v43, %s788_s16  ;;  %v569_v17 = vmul.f32 %v1038_v43, %v1038_v43  ;;  %v570_v44 = vmul.f32 %v1036_v42, %v1036_v42  ;;  %v571_v45 = vmul.f32 %v1040_v18, %v1040_v18 }
 0x389   :  { %v572_v46 = vmul.f32 %v1042_v5, %v1042_v5 }
 0x38a   :  { %v573_v47 = vsel %vm90_vm1, %v569_v17, 0.0  ;;  %v574_v48 = vsel %vm90_vm1, %v570_v44, 0.0  ;;  %v576_v49 = vsel %vm90_vm1, %v571_v45, 0.0 }
 0x38b   :  { %v575_v39 = vadd.f32 %v574_v48, %v573_v47  ;;  %v578_v50 = vsel %vm90_vm1, %v572_v46, 0.0 }
 0x38c   :  { %555 = vrot.lane.b32.xlu1 %v1036_v42, %s787_s15  ;;  %553 = vrot.lane.b32.xlu0 %v1038_v43, %s787_s15 }
 0x38d   :  { %v577_v40 = vadd.f32 %v576_v49, %v575_v39 }
 0x38f   :  { %v579_v51 = vadd.f32 %v578_v50, %v577_v40 }
 0x390   :  { %557 = vrot.lane.b32.xlu1 %v1040_v18, %s787_s15  ;;  %545 = vrot.lane.b32.xlu0 %v1040_v18, %s788_s16 }
 0x391   :  { %v580_v52 = vmul.f32 0.25, %v579_v51 }
 0x393   :  { %v581_v38 = vadd.f32 1e-05, %v580_v52 }
 0x394   :  { %559 = vrot.lane.b32.xlu1 %v1042_v5, %s787_s15  ;;  %547 = vrot.lane.b32.xlu0 %v1042_v5, %s788_s16 }
 0x398   :  { %598 = vrot.lane.b32.xlu1 %v581_v38, %s787_s15  ;;  %595 = vrot.lane.b32.xlu0 %v581_v38, %s788_s16 }
 0x3fa   :  { %v544_v41 = vpop.permute.xlu1 %543  ;;  %v542_v55 = vpop.permute.xlu0 %541 }
 0x3fe   :  { %v556_v56 = vpop.permute.xlu1 %555  ;;  %v554_v57 = vpop.permute.xlu0 %553 }
 0x3ff   :  { %v566_v58 = vsel %vm73_vm0, %v544_v41, %v556_v56  ;;  %v565_v59 = vsel %vm73_vm0, %v542_v55, %v554_v57 }
 0x400   :  { %v583_v60 = vmul.f32 %v566_v58, %v1036_v42  ;;  %v582_v61 = vmul.f32 %v565_v59, %v1038_v43 }
 0x402   :  { %v558_v62 = vpop.permute.xlu1 %557  ;;  %v546_v0 = vpop.permute.xlu0 %545  ;;  %v587_v2 = vsel %vm90_vm1, %v583_v60, 0.0  ;;  %v586_v3 = vsel %vm90_vm1, %v582_v61, 0.0 }
 0x403   :  { %v567_v1 = vsel %vm73_vm0, %v546_v0, %v558_v62  ;;  %v588_v10 = vadd.f32 %v587_v2, %v586_v3 }
 0x404   :  { %v584_v6 = vmul.f32 %v567_v1, %v1040_v18 }
 0x406   :  { %v589_v7 = vsel %vm90_vm1, %v584_v6, 0.0  ;;  %v560_v8 = vpop.permute.xlu1 %559  ;;  %v548_v9 = vpop.permute.xlu0 %547 }
 0x407   :  { %v568_v11 = vsel %vm73_vm0, %v548_v9, %v560_v8  ;;  %v590_v13 = vadd.f32 %v589_v7, %v588_v10 }
 0x408   :  { %v585_v12 = vmul.f32 %v568_v11, %v1042_v5 }
 0x40a   :  { %v591_v14 = vsel %vm90_vm1, %v585_v12, 0.0  ;;  %v599_v15 = vpop.permute.xlu1 %598  ;;  %v596_v16 = vpop.permute.xlu0 %595 }
 0x40b   :  { %v592_v19 = vadd.f32 %v591_v14, %v590_v13  ;;  %v601_v20 = vsel %vm73_vm0, %v596_v16, %v599_v15 }
 0x40c   :  { %v602_v23 = vmul.f32 %v601_v20, %v581_v38  ;;  %v613_v30 = vadd.f32 %v601_v20, %v581_v38 }
 0x40d   :  { %v593_v21 = vmul.f32 0.25, %v592_v19 }
 0x40f   :  { %v603_v22 = vmul.f32 %v593_v21, %v593_v21  ;;  %v620_v34 = vsub.f32 0.0, %v593_v21 }
 0x411   :  { %v604_v24 = vsub.f32 %v602_v23, %v603_v22 }
 0x413   :  { %783 = vrsqrt.f32 %v604_v24  ;;  %vm607_vm4 = vcmp.eq.f32.partialorder %v604_v24, inf  ;;  %v610_v27 = vand.u32 2147483648, %v604_v24  ;;  %vm609_vm5 = vcmp.eq.f32.partialorder %v604_v24, 0.0 }
 0x420   :  { %v784_v25 = vpop.eup %783 }
 0x421   :  { %v606_v26 = vmul.f32 %v784_v25, %v604_v24 }
 0x423   :  { %v608_v28 = vsel %vm607_vm4, %v604_v24, %v606_v26 }
 0x424   :  { %v611_v29 = vsel %vm609_vm5, %v610_v27, %v608_v28 }
 0x425   :  { %v614_v31 = vmul.f32 2.0, %v611_v29  ;;  %v618_v36 = vadd.f32 %v611_v29, %v601_v20 }
 0x427   :  { %v615_v32 = vadd.f32 %v614_v31, %v613_v30 }
 0x429   :  { %785 = vrsqrt.f32 %v615_v32 }
 0x436   :  { %v786_v33 = vpop.eup %785 }
 0x437   :  { %v617_v35 = vmul.f32 %v786_v33, %v784_v25 }
 0x439   :  { %v619_v37 = vmul.f32 %v618_v36, %v617_v35  ;;  %v621_v4 = vmul.f32 %v620_v34, %v617_v35 }
 0x43b   :  { %v623_v17 = vmul.f32 %v619_v37, %v1036_v42  ;;  %v627_v44 = vmul.f32 %v621_v4, %v566_v58  ;;  %v622_v45 = vmul.f32 %v619_v37, %v1038_v43  ;;  %v626_v46 = vmul.f32 %v621_v4, %v565_v59 }
 0x43c   :  { %v625_v47 = vmul.f32 %v619_v37, %v1042_v5  ;;  %v629_v48 = vmul.f32 %v621_v4, %v568_v11  ;;  %v624_v40 = vmul.f32 %v619_v37, %v1040_v18  ;;  %v628_v50 = vmul.f32 %v621_v4, %v567_v1 }
 0x43d   :  { %v631_v39 = vadd.f32 %v627_v44, %v623_v17  ;;  %v630_v49 = vadd.f32 %v626_v46, %v622_v45 }
 0x43e   :  { %v633_v51 = vadd.f32 %v629_v48, %v625_v47  ;;  %v632_v52 = vadd.f32 %v628_v50, %v624_v40 }
 0x43f   :  { %640 = vrot.lane.b32.xlu1 %v631_v39, %s788_s16  ;;  %638 = vrot.lane.b32.xlu0 %v630_v49, %s788_s16  ;;  %v667_v57 = vmul.f32 %v956_v53, %v631_v39  ;;  %v666_v59 = vmul.f32 %v956_v53, %v630_v49 }
 0x440   :  { %v669_v2 = vmul.f32 %v956_v53, %v633_v51  ;;  %v668_v6 = vmul.f32 %v956_v53, %v632_v52 }
 0x443   :  { %644 = vrot.lane.b32.xlu1 %v633_v51, %s788_s16  ;;  %642 = vrot.lane.b32.xlu0 %v632_v52, %s788_s16 }
 0x447   :  { %652 = vrot.lane.b32.xlu1 %v631_v39, %s787_s15  ;;  %650 = vrot.lane.b32.xlu0 %v630_v49, %s787_s15 }
 0x44b   :  { %656 = vrot.lane.b32.xlu1 %v633_v51, %s787_s15  ;;  %654 = vrot.lane.b32.xlu0 %v632_v52, %s787_s15 }
 0x4b1   :  { %v641_v42 = vpop.permute.xlu1 %640  ;;  %v639_v43 = vpop.permute.xlu0 %638 }
 0x4b5   :  { %v645_v18 = vpop.permute.xlu1 %644  ;;  %v643_v5 = vpop.permute.xlu0 %642 }
 0x4b9   :  { %v653_v38 = vpop.permute.xlu1 %652  ;;  %v651_v41 = vpop.permute.xlu0 %650 }
 0x4ba   :  { %v663_v55 = vsel %vm73_vm0, %v641_v42, %v653_v38  ;;  %v662_v56 = vsel %vm73_vm0, %v639_v43, %v651_v41 }
 0x4bb   :  { %v671_v58 = vmul.f32 %v961_v54, %v663_v55  ;;  %v670_v60 = vmul.f32 %v961_v54, %v662_v56 }
 0x4bd   :  { %v675_v61 = vadd.f32 %v671_v58, %v667_v57  ;;  %v674_v62 = vadd.f32 %v670_v60, %v666_v59  ;;  %v657_v0 = vpop.permute.xlu1 %656  ;;  %v655_v1 = vpop.permute.xlu0 %654 }
 0x4be   :  { %v665_v3 = vsel %vm73_vm0, %v645_v18, %v657_v0  ;;  %v664_v7 = vsel %vm73_vm0, %v643_v5, %v655_v1 }
 0x4bf   :  { %v679_v8 = vadd.f32 %v972_v63, %v675_v61  ;;  %v678_v9 = vadd.f32 %v972_v63, %v674_v62  ;;  %v673_v10 = vmul.f32 %v961_v54, %v665_v3  ;;  %v672_v11 = vmul.f32 %v961_v54, %v664_v7 }
 0x4c1   :  { %683 = vst.msk [vmem:[%s1141_s10 + $0x8] sm:$0xff] %vm90_vm1, %v679_v8  ;;  %682 = vst.msk [vmem:[%s1141_s10] sm:$0xff] %vm90_vm1, %v678_v9  ;;  %v677_v53 = vadd.f32 %v673_v10, %v669_v2  ;;  %v676_v12 = vadd.f32 %v672_v11, %v668_v6 }
 0x4c3   :  { %v681_v13 = vadd.f32 %v972_v63, %v677_v53  ;;  %v680_v14 = vadd.f32 %v972_v63, %v676_v12 }
 0x4c5   :  { %685 = vst.msk [vmem:[%s1141_s10 + $0x18] sm:$0xff] %vm90_vm1, %v681_v13  ;;  %684 = vst.msk [vmem:[%s1141_s10 + $0x10] sm:$0xff] %vm90_vm1, %v680_v14 }

</bundles_post_ra>
